<compile_context>
chip_gen: v7x
topology: tpu7x:2x2x1
jax: 0.10.0
libtpu: 0.0.40
codegen_flags: <defaults>
</compile_context>

<pallas_src>
import functools

import jax
import jax.numpy as jnp
from jax import lax
from jax.experimental import pallas as pl
from jax.experimental.pallas import tpu as pltpu


# Conservative explicit VMEM budget (<= physical on v5e/v6e/v7x).  For large
# T/B/H raise toward ~48 MiB on v7x / ~100 MiB on v5e/v6e.
_VMEM_LIMIT_BYTES = 32 * 1024 * 1024


def _divisor_block(dim, requested, multiple_of=1):
    """Largest block <= requested that divides `dim` and is either a multiple
    of `multiple_of` or equal to `dim` (TPU sublane/lane block legality)."""
    if requested is None or requested >= dim:
        return dim
    for cand in range(min(requested, dim), 0, -1):
        if dim % cand == 0 and (cand % multiple_of == 0 or cand == dim):
            return cand
    return dim


def _pick_unroll(n):
    for cand in (8, 4, 2):
        if n % cand == 0 and n >= cand:
            return cand
    return 1


# ----------------------------------------------------------------------------
# Pallas kernels
# ----------------------------------------------------------------------------
def _lstm_chunk_kernel(x_ref, wih_ref, whh_ref, b_ref, out_ref,
                       xg_ref, h_ref, c_ref):
    """One (batch_block, time_block) chunk of an LSTM layer, time-major.

    x_ref   : (Tt, Bt, D)    input chunk
    wih_ref : (D, 4H)        W_ih^T
    whh_ref : (H, 4H)        W_hh^T
    b_ref   : (1, 4H)        b_ih + b_hh
    out_ref : (Tt, Bt, H)    hidden states h_t for this chunk
    xg_ref  : VMEM (Tt, Bt, 4H) f32 scratch — per-chunk input projection
    h_ref   : VMEM (Bt, H)   f32 — hidden state carried across time chunks
    c_ref   : VMEM (Bt, H)   f32 — cell   state carried across time chunks
    """
    t_block = pl.program_id(1)            # grid = (batch_blocks, time_blocks)

    @pl.when(t_block == 0)
    def _init_state():
        h_ref[...] = jnp.zeros_like(h_ref)
        c_ref[...] = jnp.zeros_like(c_ref)

    Tt, Bt, D = x_ref.shape
    H = whh_ref.shape[0]

    # Weights stay resident in VMEM across the whole grid (constant block
    # index); cast is a no-op for f32 storage, hoisted out of the step loop
    # for narrower storage dtypes.
    wih = wih_ref[...].astype(jnp.float32)
    whh = whh_ref[...].astype(jnp.float32)
    bias = b_ref[...].astype(jnp.float32)

    # Input projection for the whole chunk: one MXU matmul off the recurrence
    # critical path; each step only needs the small h @ W_hh matmul.
    xg = jnp.dot(x_ref[...].reshape(Tt * Bt, D).astype(jnp.float32), wih,
                 preferred_element_type=jnp.float32) + bias
    xg_ref[...] = xg.reshape(Tt, Bt, 4 * H)

    def step(t, carry):
        h, c = carry
        # gates: (Bt, 4H), PyTorch gate order [i, f, g, o]
        g = xg_ref[t] + jnp.dot(h, whh, preferred_element_type=jnp.float32)
        # TODO(synk): for production, pick H as a multiple of 128 so these
        # gate slices are lane-aligned (avoids masked sub-vreg selects).
        i_g = jax.nn.sigmoid(g[:, 0 * H:1 * H])
        f_g = jax.nn.sigmoid(g[:, 1 * H:2 * H])
        g_g = jnp.tanh(g[:, 2 * H:3 * H])
        o_g = jax.nn.sigmoid(g[:, 3 * H:4 * H])
        c_new = f_g * c + i_g * g_g
        h_new = o_g * jnp.tanh(c_new)
        out_ref[t] = h_new.astype(out_ref.dtype)
        return (h_new, c_new)

    # Partial unroll so the LLO scheduler can overlap store/EUP of step t with
    # the MXU issue of step t+1.
    h, c = lax.fori_loop(0, Tt, step, (h_ref[...], c_ref[...]),
                         unroll=_pick_unroll(Tt))
    h_ref[...] = h
    c_ref[...] = c


def _fc_softmax_kernel(h_ref, w_ref, b_ref, out_ref):
    """Linear head + softmax over the TIME axis, consuming time-major input.

    h_ref : (T, Bt, H)   LSTM hidden states (time-major, batch-tiled)
    w_ref : (H, O)       fc.weight^T
    b_ref : (1, O)       fc.bias
    out_ref : (T, Bt, O) softmax over axis 0 (time) == torch softmax(dim=1)
    """
    T, Bt, H = h_ref.shape
    O = w_ref.shape[1]
    w = w_ref[...].astype(jnp.float32)
    b = b_ref[...].astype(jnp.float32)
    logits = jnp.dot(h_ref[...].reshape(T * Bt, H).astype(jnp.float32), w,
                     preferred_element_type=jnp.float32) + b
    logits = logits.reshape(T, Bt, O)
    m = jnp.max(logits, axis=0, keepdims=True)
    e = jnp.exp(logits - m)
    s = jnp.sum(e, axis=0, keepdims=True)
    out_ref[...] = (e / s).astype(out_ref.dtype)


# ----------------------------------------------------------------------------
# Wrappers calling pallas_call
# ----------------------------------------------------------------------------
def lstm_layer(x_tbd, wih_t, whh_t, bias, *, time_block, batch_block):
    """x_tbd: (T, B, D) time-major. wih_t: (D,4H), whh_t: (H,4H), bias: (1,4H)."""
    T, B, D = x_tbd.shape
    H = whh_t.shape[0]
    Tt = _divisor_block(T, time_block)                    # leading dim, no tile rule
    Bt = _divisor_block(B, batch_block, multiple_of=8)    # sublane dim of blocks
    grid = (B // Bt, T // Tt)

    return pl.pallas_call(
        _lstm_chunk_kernel,
        out_shape=jax.ShapeDtypeStruct((T, B, H), jnp.float32),
        grid=grid,
        in_specs=[
            pl.BlockSpec((Tt, Bt, D), lambda b, t: (t, b, 0)),
            pl.BlockSpec((D, 4 * H), lambda b, t: (0, 0)),
            pl.BlockSpec((H, 4 * H), lambda b, t: (0, 0)),
            pl.BlockSpec((1, 4 * H), lambda b, t: (0, 0)),
        ],
        out_specs=pl.BlockSpec((Tt, Bt, H), lambda b, t: (t, b, 0)),
        scratch_shapes=[
            pltpu.VMEM((Tt, Bt, 4 * H), jnp.float32),   # per-chunk input proj
            pltpu.VMEM((Bt, H), jnp.float32),           # carried h
            pltpu.VMEM((Bt, H), jnp.float32),           # carried c
        ],
        compiler_params=pltpu.CompilerParams(
            dimension_semantics=("parallel", "arbitrary"),   # batch ||, time seq
            vmem_limit_bytes=_VMEM_LIMIT_BYTES,
        ),
    )(x_tbd, wih_t, whh_t, bias)


def fc_softmax_time(h_tbh, fcw_t, fcb, *, batch_block):
    """h_tbh: (T, B, H) time-major. fcw_t: (H, O), fcb: (1, O). Returns (T, B, O)."""
    T, B, H = h_tbh.shape
    O = fcw_t.shape[1]
    Bt = _divisor_block(B, batch_block, multiple_of=8)

    return pl.pallas_call(
        _fc_softmax_kernel,
        out_shape=jax.ShapeDtypeStruct((T, B, O), jnp.float32),
        grid=(B // Bt,),
        in_specs=[
            pl.BlockSpec((T, Bt, H), lambda b: (0, b, 0)),
            pl.BlockSpec((H, O), lambda b: (0, 0)),
            pl.BlockSpec((1, O), lambda b: (0, 0)),
        ],
        out_specs=pl.BlockSpec((T, Bt, O), lambda b: (0, b, 0)),
        compiler_params=pltpu.CompilerParams(
            dimension_semantics=("parallel",),
            vmem_limit_bytes=_VMEM_LIMIT_BYTES,
        ),
    )(h_tbh, fcw_t, fcb)


@functools.partial(jax.jit,
                   static_argnames=("num_layers", "time_block", "batch_block"))
def lstm_classifier_forward(x, packed, num_layers, time_block=32, batch_block=8):
    """x: (B, T, input_dim) batch_first (like the PyTorch module).

    Internally everything is time-major so the big (T,B,H) activations never
    round-trip HBM through a transpose; only the small input and the tiny
    (T,B,O) output are transposed as glue.
    """
    h = jnp.transpose(x, (1, 0, 2)).astype(jnp.float32)     # (T, B, D_in)
    for l in range(num_layers):
        h = lstm_layer(
            h,
            packed[f"wih_l{l}"], packed[f"whh_l{l}"], packed[f"b_l{l}"],
            time_block=time_block, batch_block=batch_block,
        )
    out_tbo = fc_softmax_time(h, packed["fc_w"], packed["fc_b"],
                              batch_block=batch_block)       # (T, B, O)
    return jnp.transpose(out_tbo, (1, 0, 2))                 # (B, T, O)


# ----------------------------------------------------------------------------
# One-time parameter packing (hoists transposes / bias combine out of forward)
# ----------------------------------------------------------------------------
def pack_params(raw, num_layers, storage_dtype=jnp.float32):
    """Pre-transpose weights and combine biases.

    storage_dtype=jnp.float32 (default): no per-step casts, tight numerics.
    storage_dtype=jnp.bfloat16: halves weight HBM/VMEM footprint for large H
    (matmuls still accumulate in f32 inside the kernels).
    """
    packed = {}
    for l in range(num_layers):
        packed[f"wih_l{l}"] = jnp.asarray(raw[f"w_ih_l{l}"].T, storage_dtype)  # (D, 4H)
        packed[f"whh_l{l}"] = jnp.asarray(raw[f"w_hh_l{l}"].T, storage_dtype)  # (H, 4H)
        b = raw[f"b_ih_l{l}"] + raw[f"b_hh_l{l}"]
        packed[f"b_l{l}"] = jnp.asarray(b.reshape(1, -1), jnp.float32)         # (1, 4H)
    packed["fc_w"] = jnp.asarray(raw["fc_w"].T, storage_dtype)                 # (H, O)
    packed["fc_b"] = jnp.asarray(raw["fc_b"].reshape(1, -1), jnp.float32)      # (1, O)
    return packed


# ----------------------------------------------------------------------------
# Deterministic parameter init (PyTorch-style U(-1/sqrt(H), 1/sqrt(H)))
# ----------------------------------------------------------------------------
def init_params(key, input_dim, hidden_dim, num_layers, output_dim):
    params = {}
    bound = 1.0 / jnp.sqrt(hidden_dim)
    keys = jax.random.split(key, 4 * num_layers + 2)
    ki = 0
    for l in range(num_layers):
        d_in = input_dim if l == 0 else hidden_dim
        params[f"w_ih_l{l}"] = jax.random.uniform(
            keys[ki], (4 * hidden_dim, d_in), jnp.float32, -bound, bound); ki += 1
        params[f"w_hh_l{l}"] = jax.random.uniform(
            keys[ki], (4 * hidden_dim, hidden_dim), jnp.float32, -bound, bound); ki += 1
        params[f"b_ih_l{l}"] = jax.random.uniform(
            keys[ki], (4 * hidden_dim,), jnp.float32, -bound, bound); ki += 1
        params[f"b_hh_l{l}"] = jax.random.uniform(
            keys[ki], (4 * hidden_dim,), jnp.float32, -bound, bound); ki += 1
    params["fc_w"] = jax.random.uniform(
        keys[ki], (output_dim, hidden_dim), jnp.float32, -bound, bound); ki += 1
    params["fc_b"] = jax.random.uniform(
        keys[ki], (output_dim,), jnp.float32, -bound, bound)
    return params


# ----------------------------------------------------------------------------
# Pure-JAX reference (same packed weights, f32 math) for correctness check
# ----------------------------------------------------------------------------
def reference_forward(x, packed, num_layers):
    B, T, _ = x.shape
    h_seq = x.astype(jnp.float32)
    for l in range(num_layers):
        wih = packed[f"wih_l{l}"].astype(jnp.float32)    # (D, 4H)
        whh = packed[f"whh_l{l}"].astype(jnp.float32)    # (H, 4H)
        b = packed[f"b_l{l}"].astype(jnp.float32)        # (1, 4H)
        H = whh.shape[0]
        h = jnp.zeros((B, H), jnp.float32)
        c = jnp.zeros((B, H), jnp.float32)
        outs = []
        for t in range(T):
            g = h_seq[:, t, :] @ wih + h @ whh + b
            i = jax.nn.sigmoid(g[:, 0 * H:1 * H])
            f = jax.nn.sigmoid(g[:, 1 * H:2 * H])
            gg = jnp.tanh(g[:, 2 * H:3 * H])
            o = jax.nn.sigmoid(g[:, 3 * H:4 * H])
            c = f * c + i * gg
            h = o * jnp.tanh(c)
            outs.append(h)
        h_seq = jnp.stack(outs, axis=1)
    logits = h_seq @ packed["fc_w"].astype(jnp.float32) + packed["fc_b"].astype(jnp.float32)
    return jax.nn.softmax(logits, axis=1)   # softmax over dim=1 (time), as in torch code


# ----------------------------------------------------------------------------
if __name__ == "__main__":
    B, T = 2, 16
    input_dim, hidden_dim, num_layers, output_dim = 16, 32, 2, 4

    key = jax.random.PRNGKey(0)
    kx, kp = jax.random.split(key)
    x = jax.random.normal(kx, (B, T, input_dim), jnp.float32)

    raw_params = init_params(kp, input_dim, hidden_dim, num_layers, output_dim)
    packed = pack_params(raw_params, num_layers, storage_dtype=jnp.float32)

    out = lstm_classifier_forward(x, packed, num_layers,
                                  time_block=8, batch_block=8)
    out = jax.block_until_ready(out)

    ref = reference_forward(x, packed, num_layers)
    assert out.shape == (B, T, output_dim), out.shape
    assert jnp.allclose(out, ref, atol=5e-5, rtol=5e-5), \
        float(jnp.max(jnp.abs(out - ref)))

    print("KERNEL_OK")
</pallas_src>

<mosaic_0001>
module attributes {stable_mosaic.version = 11 : i64} {
  func.func @_lstm_chunk_kernel(%arg0: i32, %arg1: i32, %arg2: memref<8x2x16xf32, #tpu.memory_space<vmem>>, %arg3: memref<16x128xf32, #tpu.memory_space<vmem>>, %arg4: memref<32x128xf32, #tpu.memory_space<vmem>>, %arg5: memref<1x128xf32, #tpu.memory_space<vmem>>, %arg6: memref<8x2x32xf32, #tpu.memory_space<vmem>>, %arg7: memref<8x2x128xf32, #tpu.memory_space<vmem>>, %arg8: memref<2x32xf32, #tpu.memory_space<vmem>>, %arg9: memref<2x32xf32, #tpu.memory_space<vmem>>) attributes {dimension_semantics = [#tpu.dimension_semantics<parallel>, #tpu.dimension_semantics<arbitrary>], iteration_bounds = array<i64: 1, 2>, scalar_prefetch = 0 : i64, scratch_operands = 3 : i64, tpu.core_type = #tpu.core_type<tc>, window_params = [{transform_indices = @transform_0, window_bounds = array<i64: 8, 2, 16>}, {pipeline_mode = #tpu.pipeline_mode<synchronous>, transform_indices = @transform_1, window_bounds = array<i64: 16, 128>}, {pipeline_mode = #tpu.pipeline_mode<synchronous>, transform_indices = @transform_2, window_bounds = array<i64: 32, 128>}, {pipeline_mode = #tpu.pipeline_mode<synchronous>, transform_indices = @transform_3, window_bounds = array<i64: 1, 128>}, {transform_indices = @transform_4, window_bounds = array<i64: 8, 2, 32>}]} {
    %c0_i32 = arith.constant 0 : i32
    %0 = arith.cmpi eq, %arg1, %c0_i32 : i32
    %1 = arith.extui %0 : i1 to i32
    %c0_i32_0 = arith.constant 0 : i32
    %2 = arith.cmpi ne, %1, %c0_i32_0 : i32
    scf.if %2 {
      %cst_85 = arith.constant 0.000000e+00 : f32
      %289 = vector.broadcast %cst_85 : f32 to vector<2x32xf32>
      %c0_86 = arith.constant 0 : index
      %c0_87 = arith.constant 0 : index
      %290 = vector.load %arg8[%c0_86, %c0_87] : memref<2x32xf32, #tpu.memory_space<vmem>>, vector<2x32xf32>
      tpu.vector_store %arg8[%c0_86, %c0_87], %289 {strides = array<i32>} : memref<2x32xf32, #tpu.memory_space<vmem>>, vector<2x32xf32>,
      %cst_88 = arith.constant 0.000000e+00 : f32
      %291 = vector.broadcast %cst_88 : f32 to vector<2x32xf32>
      %c0_89 = arith.constant 0 : index
      %c0_90 = arith.constant 0 : index
      %292 = vector.load %arg9[%c0_89, %c0_90] : memref<2x32xf32, #tpu.memory_space<vmem>>, vector<2x32xf32>
      tpu.vector_store %arg9[%c0_89, %c0_90], %291 {strides = array<i32>} : memref<2x32xf32, #tpu.memory_space<vmem>>, vector<2x32xf32>,
    } else {
    }
    %c0 = arith.constant 0 : index
    %c0_1 = arith.constant 0 : index
    %3 = vector.load %arg3[%c0, %c0_1] : memref<16x128xf32, #tpu.memory_space<vmem>>, vector<16x128xf32>
    %c0_2 = arith.constant 0 : index
    %c0_3 = arith.constant 0 : index
    %4 = vector.load %arg4[%c0_2, %c0_3] : memref<32x128xf32, #tpu.memory_space<vmem>>, vector<32x128xf32>
    %c0_4 = arith.constant 0 : index
    %c0_5 = arith.constant 0 : index
    %5 = vector.load %arg5[%c0_4, %c0_5] : memref<1x128xf32, #tpu.memory_space<vmem>>, vector<1x128xf32>
    %c0_6 = arith.constant 0 : index
    %c0_7 = arith.constant 0 : index
    %c0_8 = arith.constant 0 : index
    %6 = vector.load %arg2[%c0_6, %c0_7, %c0_8] : memref<8x2x16xf32, #tpu.memory_space<vmem>>, vector<8x2x16xf32>
    %7 = vector.shape_cast %6 : vector<8x2x16xf32> to vector<16x16xf32>
    %cst = arith.constant dense<0.000000e+00> : vector<16x128xf32>
    %8 = tpu.matmul %7, %3, %cst {dimension_numbers = #tpu.dot_dimension_numbers<[1], [0], [0], [1], [0, 0, 1, 1], [], []>} : vector<16x16xf32>, vector<16x128xf32>, vector<16x128xf32> -> vector<16x128xf32>
    %9 = vector.broadcast %5 : vector<1x128xf32> to vector<16x128xf32>
    %10 = arith.addf %8, %9 : vector<16x128xf32>
    %11 = vector.shape_cast %10 : vector<16x128xf32> to vector<8x2x128xf32>
    %c0_9 = arith.constant 0 : index
    %c0_10 = arith.constant 0 : index
    %c0_11 = arith.constant 0 : index
    %12 = vector.load %arg7[%c0_9, %c0_10, %c0_11] : memref<8x2x128xf32, #tpu.memory_space<vmem>>, vector<8x2x128xf32>
    tpu.vector_store %arg7[%c0_9, %c0_10, %c0_11], %11 {strides = array<i32>} : memref<8x2x128xf32, #tpu.memory_space<vmem>>, vector<8x2x128xf32>,
    %c0_12 = arith.constant 0 : index
    %c0_13 = arith.constant 0 : index
    %13 = vector.load %arg8[%c0_12, %c0_13] : memref<2x32xf32, #tpu.memory_space<vmem>>, vector<2x32xf32>
    %c0_14 = arith.constant 0 : index
    %c0_15 = arith.constant 0 : index
    %14 = vector.load %arg9[%c0_14, %c0_15] : memref<2x32xf32, #tpu.memory_space<vmem>>, vector<2x32xf32>
    %c0_i32_16 = arith.constant 0 : i32
    %15 = arith.index_cast %c0_i32_16 : i32 to index
    %c0_17 = arith.constant 0 : index
    %c0_18 = arith.constant 0 : index
    %16 = vector.load %arg7[%15, %c0_17, %c0_18] : memref<8x2x128xf32, #tpu.memory_space<vmem>>, vector<1x2x128xf32>
    %17 = vector.shape_cast %16 : vector<1x2x128xf32> to vector<2x128xf32>
    %cst_19 = arith.constant dense<0.000000e+00> : vector<2x128xf32>
    %18 = tpu.matmul %13, %4, %cst_19 {dimension_numbers = #tpu.dot_dimension_numbers<[1], [0], [0], [1], [0, 0, 1, 1], [], []>} : vector<2x32xf32>, vector<32x128xf32>, vector<2x128xf32> -> vector<2x128xf32>
    %19 = arith.addf %17, %18 : vector<2x128xf32>
    %20 = vector.extract_strided_slice %19 {offsets = [0, 0], sizes = [2, 32], strides = [1, 1]} : vector<2x128xf32> to vector<2x32xf32>
    %21 = arith.negf %20 : vector<2x32xf32>
    %22 = math.exp %21 : vector<2x32xf32>
    %cst_20 = arith.constant 1.000000e+00 : f32
    %23 = vector.broadcast %cst_20 : f32 to vector<2x32xf32>
    %24 = arith.addf %23, %22 : vector<2x32xf32>
    %25 = arith.divf %23, %24 : vector<2x32xf32>
    %26 = vector.extract_strided_slice %19 {offsets = [0, 32], sizes = [2, 32], strides = [1, 1]} : vector<2x128xf32> to vector<2x32xf32>
    %27 = arith.negf %26 : vector<2x32xf32>
    %28 = math.exp %27 : vector<2x32xf32>
    %cst_21 = arith.constant 1.000000e+00 : f32
    %29 = vector.broadcast %cst_21 : f32 to vector<2x32xf32>
    %30 = arith.addf %29, %28 : vector<2x32xf32>
    %31 = arith.divf %29, %30 : vector<2x32xf32>
    %32 = vector.extract_strided_slice %19 {offsets = [0, 64], sizes = [2, 32], strides = [1, 1]} : vector<2x128xf32> to vector<2x32xf32>
    %33 = math.tanh %32 : vector<2x32xf32>
    %34 = vector.extract_strided_slice %19 {offsets = [0, 96], sizes = [2, 32], strides = [1, 1]} : vector<2x128xf32> to vector<2x32xf32>
    %35 = arith.negf %34 : vector<2x32xf32>
    %36 = math.exp %35 : vector<2x32xf32>
    %cst_22 = arith.constant 1.000000e+00 : f32
    %37 = vector.broadcast %cst_22 : f32 to vector<2x32xf32>
    %38 = arith.addf %37, %36 : vector<2x32xf32>
    %39 = arith.divf %37, %38 : vector<2x32xf32>
    %40 = arith.mulf %31, %14 : vector<2x32xf32>
    %41 = arith.mulf %25, %33 : vector<2x32xf32>
    %42 = arith.addf %40, %41 : vector<2x32xf32>
    %43 = math.tanh %42 : vector<2x32xf32>
    %44 = arith.mulf %39, %43 : vector<2x32xf32>
    %45 = arith.index_cast %c0_i32_16 : i32 to index
    %c0_23 = arith.constant 0 : index
    %c0_24 = arith.constant 0 : index
    %46 = vector.load %arg6[%45, %c0_23, %c0_24] : memref<8x2x32xf32, #tpu.memory_space<vmem>>, vector<1x2x32xf32>
    %47 = vector.shape_cast %46 : vector<1x2x32xf32> to vector<2x32xf32>
    %48 = vector.shape_cast %44 : vector<2x32xf32> to vector<1x2x32xf32>
    tpu.vector_store %arg6[%45, %c0_23, %c0_24], %48 {strides = array<i32>} : memref<8x2x32xf32, #tpu.memory_space<vmem>>, vector<1x2x32xf32>,
    %c1_i32 = arith.constant 1 : i32
    %49 = arith.index_cast %c1_i32 : i32 to index
    %c0_25 = arith.constant 0 : index
    %c0_26 = arith.constant 0 : index
    %50 = vector.load %arg7[%49, %c0_25, %c0_26] : memref<8x2x128xf32, #tpu.memory_space<vmem>>, vector<1x2x128xf32>
    %51 = vector.shape_cast %50 : vector<1x2x128xf32> to vector<2x128xf32>
    %cst_27 = arith.constant dense<0.000000e+00> : vector<2x128xf32>
    %52 = tpu.matmul %44, %4, %cst_27 {dimension_numbers = #tpu.dot_dimension_numbers<[1], [0], [0], [1], [0, 0, 1, 1], [], []>} : vector<2x32xf32>, vector<32x128xf32>, vector<2x128xf32> -> vector<2x128xf32>
    %53 = arith.addf %51, %52 : vector<2x128xf32>
    %54 = vector.extract_strided_slice %53 {offsets = [0, 0], sizes = [2, 32], strides = [1, 1]} : vector<2x128xf32> to vector<2x32xf32>
    %55 = arith.negf %54 : vector<2x32xf32>
    %56 = math.exp %55 : vector<2x32xf32>
    %cst_28 = arith.constant 1.000000e+00 : f32
    %57 = vector.broadcast %cst_28 : f32 to vector<2x32xf32>
    %58 = arith.addf %57, %56 : vector<2x32xf32>
    %59 = arith.divf %57, %58 : vector<2x32xf32>
    %60 = vector.extract_strided_slice %53 {offsets = [0, 32], sizes = [2, 32], strides = [1, 1]} : vector<2x128xf32> to vector<2x32xf32>
    %61 = arith.negf %60 : vector<2x32xf32>
    %62 = math.exp %61 : vector<2x32xf32>
    %cst_29 = arith.constant 1.000000e+00 : f32
    %63 = vector.broadcast %cst_29 : f32 to vector<2x32xf32>
    %64 = arith.addf %63, %62 : vector<2x32xf32>
    %65 = arith.divf %63, %64 : vector<2x32xf32>
    %66 = vector.extract_strided_slice %53 {offsets = [0, 64], sizes = [2, 32], strides = [1, 1]} : vector<2x128xf32> to vector<2x32xf32>
    %67 = math.tanh %66 : vector<2x32xf32>
    %68 = vector.extract_strided_slice %53 {offsets = [0, 96], sizes = [2, 32], strides = [1, 1]} : vector<2x128xf32> to vector<2x32xf32>
    %69 = arith.negf %68 : vector<2x32xf32>
    %70 = math.exp %69 : vector<2x32xf32>
    %cst_30 = arith.constant 1.000000e+00 : f32
    %71 = vector.broadcast %cst_30 : f32 to vector<2x32xf32>
    %72 = arith.addf %71, %70 : vector<2x32xf32>
    %73 = arith.divf %71, %72 : vector<2x32xf32>
    %74 = arith.mulf %65, %42 : vector<2x32xf32>
    %75 = arith.mulf %59, %67 : vector<2x32xf32>
    %76 = arith.addf %74, %75 : vector<2x32xf32>
    %77 = math.tanh %76 : vector<2x32xf32>
    %78 = arith.mulf %73, %77 : vector<2x32xf32>
    %79 = arith.index_cast %c1_i32 : i32 to index
    %c0_31 = arith.constant 0 : index
    %c0_32 = arith.constant 0 : index
    %80 = vector.load %arg6[%79, %c0_31, %c0_32] : memref<8x2x32xf32, #tpu.memory_space<vmem>>, vector<1x2x32xf32>
    %81 = vector.shape_cast %80 : vector<1x2x32xf32> to vector<2x32xf32>
    %82 = vector.shape_cast %78 : vector<2x32xf32> to vector<1x2x32xf32>
    tpu.vector_store %arg6[%79, %c0_31, %c0_32], %82 {strides = array<i32>} : memref<8x2x32xf32, #tpu.memory_space<vmem>>, vector<1x2x32xf32>,
    %c2_i32 = arith.constant 2 : i32
    %83 = arith.index_cast %c2_i32 : i32 to index
    %c0_33 = arith.constant 0 : index
    %c0_34 = arith.constant 0 : index
    %84 = vector.load %arg7[%83, %c0_33, %c0_34] : memref<8x2x128xf32, #tpu.memory_space<vmem>>, vector<1x2x128xf32>
    %85 = vector.shape_cast %84 : vector<1x2x128xf32> to vector<2x128xf32>
    %cst_35 = arith.constant dense<0.000000e+00> : vector<2x128xf32>
    %86 = tpu.matmul %78, %4, %cst_35 {dimension_numbers = #tpu.dot_dimension_numbers<[1], [0], [0], [1], [0, 0, 1, 1], [], []>} : vector<2x32xf32>, vector<32x128xf32>, vector<2x128xf32> -> vector<2x128xf32>
    %87 = arith.addf %85, %86 : vector<2x128xf32>
    %88 = vector.extract_strided_slice %87 {offsets = [0, 0], sizes = [2, 32], strides = [1, 1]} : vector<2x128xf32> to vector<2x32xf32>
    %89 = arith.negf %88 : vector<2x32xf32>
    %90 = math.exp %89 : vector<2x32xf32>
    %cst_36 = arith.constant 1.000000e+00 : f32
    %91 = vector.broadcast %cst_36 : f32 to vector<2x32xf32>
    %92 = arith.addf %91, %90 : vector<2x32xf32>
    %93 = arith.divf %91, %92 : vector<2x32xf32>
    %94 = vector.extract_strided_slice %87 {offsets = [0, 32], sizes = [2, 32], strides = [1, 1]} : vector<2x128xf32> to vector<2x32xf32>
    %95 = arith.negf %94 : vector<2x32xf32>
    %96 = math.exp %95 : vector<2x32xf32>
    %cst_37 = arith.constant 1.000000e+00 : f32
    %97 = vector.broadcast %cst_37 : f32 to vector<2x32xf32>
    %98 = arith.addf %97, %96 : vector<2x32xf32>
    %99 = arith.divf %97, %98 : vector<2x32xf32>
    %100 = vector.extract_strided_slice %87 {offsets = [0, 64], sizes = [2, 32], strides = [1, 1]} : vector<2x128xf32> to vector<2x32xf32>
    %101 = math.tanh %100 : vector<2x32xf32>
    %102 = vector.extract_strided_slice %87 {offsets = [0, 96], sizes = [2, 32], strides = [1, 1]} : vector<2x128xf32> to vector<2x32xf32>
    %103 = arith.negf %102 : vector<2x32xf32>
    %104 = math.exp %103 : vector<2x32xf32>
    %cst_38 = arith.constant 1.000000e+00 : f32
    %105 = vector.broadcast %cst_38 : f32 to vector<2x32xf32>
    %106 = arith.addf %105, %104 : vector<2x32xf32>
    %107 = arith.divf %105, %106 : vector<2x32xf32>
    %108 = arith.mulf %99, %76 : vector<2x32xf32>
    %109 = arith.mulf %93, %101 : vector<2x32xf32>
    %110 = arith.addf %108, %109 : vector<2x32xf32>
    %111 = math.tanh %110 : vector<2x32xf32>
    %112 = arith.mulf %107, %111 : vector<2x32xf32>
    %113 = arith.index_cast %c2_i32 : i32 to index
    %c0_39 = arith.constant 0 : index
    %c0_40 = arith.constant 0 : index
    %114 = vector.load %arg6[%113, %c0_39, %c0_40] : memref<8x2x32xf32, #tpu.memory_space<vmem>>, vector<1x2x32xf32>
    %115 = vector.shape_cast %114 : vector<1x2x32xf32> to vector<2x32xf32>
    %116 = vector.shape_cast %112 : vector<2x32xf32> to vector<1x2x32xf32>
    tpu.vector_store %arg6[%113, %c0_39, %c0_40], %116 {strides = array<i32>} : memref<8x2x32xf32, #tpu.memory_space<vmem>>, vector<1x2x32xf32>,
    %c3_i32 = arith.constant 3 : i32
    %117 = arith.index_cast %c3_i32 : i32 to index
    %c0_41 = arith.constant 0 : index
    %c0_42 = arith.constant 0 : index
    %118 = vector.load %arg7[%117, %c0_41, %c0_42] : memref<8x2x128xf32, #tpu.memory_space<vmem>>, vector<1x2x128xf32>
    %119 = vector.shape_cast %118 : vector<1x2x128xf32> to vector<2x128xf32>
    %cst_43 = arith.constant dense<0.000000e+00> : vector<2x128xf32>
    %120 = tpu.matmul %112, %4, %cst_43 {dimension_numbers = #tpu.dot_dimension_numbers<[1], [0], [0], [1], [0, 0, 1, 1], [], []>} : vector<2x32xf32>, vector<32x128xf32>, vector<2x128xf32> -> vector<2x128xf32>
    %121 = arith.addf %119, %120 : vector<2x128xf32>
    %122 = vector.extract_strided_slice %121 {offsets = [0, 0], sizes = [2, 32], strides = [1, 1]} : vector<2x128xf32> to vector<2x32xf32>
    %123 = arith.negf %122 : vector<2x32xf32>
    %124 = math.exp %123 : vector<2x32xf32>
    %cst_44 = arith.constant 1.000000e+00 : f32
    %125 = vector.broadcast %cst_44 : f32 to vector<2x32xf32>
    %126 = arith.addf %125, %124 : vector<2x32xf32>
    %127 = arith.divf %125, %126 : vector<2x32xf32>
    %128 = vector.extract_strided_slice %121 {offsets = [0, 32], sizes = [2, 32], strides = [1, 1]} : vector<2x128xf32> to vector<2x32xf32>
    %129 = arith.negf %128 : vector<2x32xf32>
    %130 = math.exp %129 : vector<2x32xf32>
    %cst_45 = arith.constant 1.000000e+00 : f32
    %131 = vector.broadcast %cst_45 : f32 to vector<2x32xf32>
    %132 = arith.addf %131, %130 : vector<2x32xf32>
    %133 = arith.divf %131, %132 : vector<2x32xf32>
    %134 = vector.extract_strided_slice %121 {offsets = [0, 64], sizes = [2, 32], strides = [1, 1]} : vector<2x128xf32> to vector<2x32xf32>
    %135 = math.tanh %134 : vector<2x32xf32>
    %136 = vector.extract_strided_slice %121 {offsets = [0, 96], sizes = [2, 32], strides = [1, 1]} : vector<2x128xf32> to vector<2x32xf32>
    %137 = arith.negf %136 : vector<2x32xf32>
    %138 = math.exp %137 : vector<2x32xf32>
    %cst_46 = arith.constant 1.000000e+00 : f32
    %139 = vector.broadcast %cst_46 : f32 to vector<2x32xf32>
    %140 = arith.addf %139, %138 : vector<2x32xf32>
    %141 = arith.divf %139, %140 : vector<2x32xf32>
    %142 = arith.mulf %133, %110 : vector<2x32xf32>
    %143 = arith.mulf %127, %135 : vector<2x32xf32>
    %144 = arith.addf %142, %143 : vector<2x32xf32>
    %145 = math.tanh %144 : vector<2x32xf32>
    %146 = arith.mulf %141, %145 : vector<2x32xf32>
    %147 = arith.index_cast %c3_i32 : i32 to index
    %c0_47 = arith.constant 0 : index
    %c0_48 = arith.constant 0 : index
    %148 = vector.load %arg6[%147, %c0_47, %c0_48] : memref<8x2x32xf32, #tpu.memory_space<vmem>>, vector<1x2x32xf32>
    %149 = vector.shape_cast %148 : vector<1x2x32xf32> to vector<2x32xf32>
    %150 = vector.shape_cast %146 : vector<2x32xf32> to vector<1x2x32xf32>
    tpu.vector_store %arg6[%147, %c0_47, %c0_48], %150 {strides = array<i32>} : memref<8x2x32xf32, #tpu.memory_space<vmem>>, vector<1x2x32xf32>,
    %c4_i32 = arith.constant 4 : i32
    %151 = arith.index_cast %c4_i32 : i32 to index
    %c0_49 = arith.constant 0 : index
    %c0_50 = arith.constant 0 : index
    %152 = vector.load %arg7[%151, %c0_49, %c0_50] : memref<8x2x128xf32, #tpu.memory_space<vmem>>, vector<1x2x128xf32>
    %153 = vector.shape_cast %152 : vector<1x2x128xf32> to vector<2x128xf32>
    %cst_51 = arith.constant dense<0.000000e+00> : vector<2x128xf32>
    %154 = tpu.matmul %146, %4, %cst_51 {dimension_numbers = #tpu.dot_dimension_numbers<[1], [0], [0], [1], [0, 0, 1, 1], [], []>} : vector<2x32xf32>, vector<32x128xf32>, vector<2x128xf32> -> vector<2x128xf32>
    %155 = arith.addf %153, %154 : vector<2x128xf32>
    %156 = vector.extract_strided_slice %155 {offsets = [0, 0], sizes = [2, 32], strides = [1, 1]} : vector<2x128xf32> to vector<2x32xf32>
    %157 = arith.negf %156 : vector<2x32xf32>
    %158 = math.exp %157 : vector<2x32xf32>
    %cst_52 = arith.constant 1.000000e+00 : f32
    %159 = vector.broadcast %cst_52 : f32 to vector<2x32xf32>
    %160 = arith.addf %159, %158 : vector<2x32xf32>
    %161 = arith.divf %159, %160 : vector<2x32xf32>
    %162 = vector.extract_strided_slice %155 {offsets = [0, 32], sizes = [2, 32], strides = [1, 1]} : vector<2x128xf32> to vector<2x32xf32>
    %163 = arith.negf %162 : vector<2x32xf32>
    %164 = math.exp %163 : vector<2x32xf32>
    %cst_53 = arith.constant 1.000000e+00 : f32
    %165 = vector.broadcast %cst_53 : f32 to vector<2x32xf32>
    %166 = arith.addf %165, %164 : vector<2x32xf32>
    %167 = arith.divf %165, %166 : vector<2x32xf32>
    %168 = vector.extract_strided_slice %155 {offsets = [0, 64], sizes = [2, 32], strides = [1, 1]} : vector<2x128xf32> to vector<2x32xf32>
    %169 = math.tanh %168 : vector<2x32xf32>
    %170 = vector.extract_strided_slice %155 {offsets = [0, 96], sizes = [2, 32], strides = [1, 1]} : vector<2x128xf32> to vector<2x32xf32>
    %171 = arith.negf %170 : vector<2x32xf32>
    %172 = math.exp %171 : vector<2x32xf32>
    %cst_54 = arith.constant 1.000000e+00 : f32
    %173 = vector.broadcast %cst_54 : f32 to vector<2x32xf32>
    %174 = arith.addf %173, %172 : vector<2x32xf32>
    %175 = arith.divf %173, %174 : vector<2x32xf32>
    %176 = arith.mulf %167, %144 : vector<2x32xf32>
    %177 = arith.mulf %161, %169 : vector<2x32xf32>
    %178 = arith.addf %176, %177 : vector<2x32xf32>
    %179 = math.tanh %178 : vector<2x32xf32>
    %180 = arith.mulf %175, %179 : vector<2x32xf32>
    %181 = arith.index_cast %c4_i32 : i32 to index
    %c0_55 = arith.constant 0 : index
    %c0_56 = arith.constant 0 : index
    %182 = vector.load %arg6[%181, %c0_55, %c0_56] : memref<8x2x32xf32, #tpu.memory_space<vmem>>, vector<1x2x32xf32>
    %183 = vector.shape_cast %182 : vector<1x2x32xf32> to vector<2x32xf32>
    %184 = vector.shape_cast %180 : vector<2x32xf32> to vector<1x2x32xf32>
    tpu.vector_store %arg6[%181, %c0_55, %c0_56], %184 {strides = array<i32>} : memref<8x2x32xf32, #tpu.memory_space<vmem>>, vector<1x2x32xf32>,
    %c5_i32 = arith.constant 5 : i32
    %185 = arith.index_cast %c5_i32 : i32 to index
    %c0_57 = arith.constant 0 : index
    %c0_58 = arith.constant 0 : index
    %186 = vector.load %arg7[%185, %c0_57, %c0_58] : memref<8x2x128xf32, #tpu.memory_space<vmem>>, vector<1x2x128xf32>
    %187 = vector.shape_cast %186 : vector<1x2x128xf32> to vector<2x128xf32>
    %cst_59 = arith.constant dense<0.000000e+00> : vector<2x128xf32>
    %188 = tpu.matmul %180, %4, %cst_59 {dimension_numbers = #tpu.dot_dimension_numbers<[1], [0], [0], [1], [0, 0, 1, 1], [], []>} : vector<2x32xf32>, vector<32x128xf32>, vector<2x128xf32> -> vector<2x128xf32>
    %189 = arith.addf %187, %188 : vector<2x128xf32>
    %190 = vector.extract_strided_slice %189 {offsets = [0, 0], sizes = [2, 32], strides = [1, 1]} : vector<2x128xf32> to vector<2x32xf32>
    %191 = arith.negf %190 : vector<2x32xf32>
    %192 = math.exp %191 : vector<2x32xf32>
    %cst_60 = arith.constant 1.000000e+00 : f32
    %193 = vector.broadcast %cst_60 : f32 to vector<2x32xf32>
    %194 = arith.addf %193, %192 : vector<2x32xf32>
    %195 = arith.divf %193, %194 : vector<2x32xf32>
    %196 = vector.extract_strided_slice %189 {offsets = [0, 32], sizes = [2, 32], strides = [1, 1]} : vector<2x128xf32> to vector<2x32xf32>
    %197 = arith.negf %196 : vector<2x32xf32>
    %198 = math.exp %197 : vector<2x32xf32>
    %cst_61 = arith.constant 1.000000e+00 : f32
    %199 = vector.broadcast %cst_61 : f32 to vector<2x32xf32>
    %200 = arith.addf %199, %198 : vector<2x32xf32>
    %201 = arith.divf %199, %200 : vector<2x32xf32>
    %202 = vector.extract_strided_slice %189 {offsets = [0, 64], sizes = [2, 32], strides = [1, 1]} : vector<2x128xf32> to vector<2x32xf32>
    %203 = math.tanh %202 : vector<2x32xf32>
    %204 = vector.extract_strided_slice %189 {offsets = [0, 96], sizes = [2, 32], strides = [1, 1]} : vector<2x128xf32> to vector<2x32xf32>
    %205 = arith.negf %204 : vector<2x32xf32>
    %206 = math.exp %205 : vector<2x32xf32>
    %cst_62 = arith.constant 1.000000e+00 : f32
    %207 = vector.broadcast %cst_62 : f32 to vector<2x32xf32>
    %208 = arith.addf %207, %206 : vector<2x32xf32>
    %209 = arith.divf %207, %208 : vector<2x32xf32>
    %210 = arith.mulf %201, %178 : vector<2x32xf32>
    %211 = arith.mulf %195, %203 : vector<2x32xf32>
    %212 = arith.addf %210, %211 : vector<2x32xf32>
    %213 = math.tanh %212 : vector<2x32xf32>
    %214 = arith.mulf %209, %213 : vector<2x32xf32>
    %215 = arith.index_cast %c5_i32 : i32 to index
    %c0_63 = arith.constant 0 : index
    %c0_64 = arith.constant 0 : index
    %216 = vector.load %arg6[%215, %c0_63, %c0_64] : memref<8x2x32xf32, #tpu.memory_space<vmem>>, vector<1x2x32xf32>
    %217 = vector.shape_cast %216 : vector<1x2x32xf32> to vector<2x32xf32>
    %218 = vector.shape_cast %214 : vector<2x32xf32> to vector<1x2x32xf32>
    tpu.vector_store %arg6[%215, %c0_63, %c0_64], %218 {strides = array<i32>} : memref<8x2x32xf32, #tpu.memory_space<vmem>>, vector<1x2x32xf32>,
    %c6_i32 = arith.constant 6 : i32
    %219 = arith.index_cast %c6_i32 : i32 to index
    %c0_65 = arith.constant 0 : index
    %c0_66 = arith.constant 0 : index
    %220 = vector.load %arg7[%219, %c0_65, %c0_66] : memref<8x2x128xf32, #tpu.memory_space<vmem>>, vector<1x2x128xf32>
    %221 = vector.shape_cast %220 : vector<1x2x128xf32> to vector<2x128xf32>
    %cst_67 = arith.constant dense<0.000000e+00> : vector<2x128xf32>
    %222 = tpu.matmul %214, %4, %cst_67 {dimension_numbers = #tpu.dot_dimension_numbers<[1], [0], [0], [1], [0, 0, 1, 1], [], []>} : vector<2x32xf32>, vector<32x128xf32>, vector<2x128xf32> -> vector<2x128xf32>
    %223 = arith.addf %221, %222 : vector<2x128xf32>
    %224 = vector.extract_strided_slice %223 {offsets = [0, 0], sizes = [2, 32], strides = [1, 1]} : vector<2x128xf32> to vector<2x32xf32>
    %225 = arith.negf %224 : vector<2x32xf32>
    %226 = math.exp %225 : vector<2x32xf32>
    %cst_68 = arith.constant 1.000000e+00 : f32
    %227 = vector.broadcast %cst_68 : f32 to vector<2x32xf32>
    %228 = arith.addf %227, %226 : vector<2x32xf32>
    %229 = arith.divf %227, %228 : vector<2x32xf32>
    %230 = vector.extract_strided_slice %223 {offsets = [0, 32], sizes = [2, 32], strides = [1, 1]} : vector<2x128xf32> to vector<2x32xf32>
    %231 = arith.negf %230 : vector<2x32xf32>
    %232 = math.exp %231 : vector<2x32xf32>
    %cst_69 = arith.constant 1.000000e+00 : f32
    %233 = vector.broadcast %cst_69 : f32 to vector<2x32xf32>
    %234 = arith.addf %233, %232 : vector<2x32xf32>
    %235 = arith.divf %233, %234 : vector<2x32xf32>
    %236 = vector.extract_strided_slice %223 {offsets = [0, 64], sizes = [2, 32], strides = [1, 1]} : vector<2x128xf32> to vector<2x32xf32>
    %237 = math.tanh %236 : vector<2x32xf32>
    %238 = vector.extract_strided_slice %223 {offsets = [0, 96], sizes = [2, 32], strides = [1, 1]} : vector<2x128xf32> to vector<2x32xf32>
    %239 = arith.negf %238 : vector<2x32xf32>
    %240 = math.exp %239 : vector<2x32xf32>
    %cst_70 = arith.constant 1.000000e+00 : f32
    %241 = vector.broadcast %cst_70 : f32 to vector<2x32xf32>
    %242 = arith.addf %241, %240 : vector<2x32xf32>
    %243 = arith.divf %241, %242 : vector<2x32xf32>
    %244 = arith.mulf %235, %212 : vector<2x32xf32>
    %245 = arith.mulf %229, %237 : vector<2x32xf32>
    %246 = arith.addf %244, %245 : vector<2x32xf32>
    %247 = math.tanh %246 : vector<2x32xf32>
    %248 = arith.mulf %243, %247 : vector<2x32xf32>
    %249 = arith.index_cast %c6_i32 : i32 to index
    %c0_71 = arith.constant 0 : index
    %c0_72 = arith.constant 0 : index
    %250 = vector.load %arg6[%249, %c0_71, %c0_72] : memref<8x2x32xf32, #tpu.memory_space<vmem>>, vector<1x2x32xf32>
    %251 = vector.shape_cast %250 : vector<1x2x32xf32> to vector<2x32xf32>
    %252 = vector.shape_cast %248 : vector<2x32xf32> to vector<1x2x32xf32>
    tpu.vector_store %arg6[%249, %c0_71, %c0_72], %252 {strides = array<i32>} : memref<8x2x32xf32, #tpu.memory_space<vmem>>, vector<1x2x32xf32>,
    %c7_i32 = arith.constant 7 : i32
    %253 = arith.index_cast %c7_i32 : i32 to index
    %c0_73 = arith.constant 0 : index
    %c0_74 = arith.constant 0 : index
    %254 = vector.load %arg7[%253, %c0_73, %c0_74] : memref<8x2x128xf32, #tpu.memory_space<vmem>>, vector<1x2x128xf32>
    %255 = vector.shape_cast %254 : vector<1x2x128xf32> to vector<2x128xf32>
    %cst_75 = arith.constant dense<0.000000e+00> : vector<2x128xf32>
    %256 = tpu.matmul %248, %4, %cst_75 {dimension_numbers = #tpu.dot_dimension_numbers<[1], [0], [0], [1], [0, 0, 1, 1], [], []>} : vector<2x32xf32>, vector<32x128xf32>, vector<2x128xf32> -> vector<2x128xf32>
    %257 = arith.addf %255, %256 : vector<2x128xf32>
    %258 = vector.extract_strided_slice %257 {offsets = [0, 0], sizes = [2, 32], strides = [1, 1]} : vector<2x128xf32> to vector<2x32xf32>
    %259 = arith.negf %258 : vector<2x32xf32>
    %260 = math.exp %259 : vector<2x32xf32>
    %cst_76 = arith.constant 1.000000e+00 : f32
    %261 = vector.broadcast %cst_76 : f32 to vector<2x32xf32>
    %262 = arith.addf %261, %260 : vector<2x32xf32>
    %263 = arith.divf %261, %262 : vector<2x32xf32>
    %264 = vector.extract_strided_slice %257 {offsets = [0, 32], sizes = [2, 32], strides = [1, 1]} : vector<2x128xf32> to vector<2x32xf32>
    %265 = arith.negf %264 : vector<2x32xf32>
    %266 = math.exp %265 : vector<2x32xf32>
    %cst_77 = arith.constant 1.000000e+00 : f32
    %267 = vector.broadcast %cst_77 : f32 to vector<2x32xf32>
    %268 = arith.addf %267, %266 : vector<2x32xf32>
    %269 = arith.divf %267, %268 : vector<2x32xf32>
    %270 = vector.extract_strided_slice %257 {offsets = [0, 64], sizes = [2, 32], strides = [1, 1]} : vector<2x128xf32> to vector<2x32xf32>
    %271 = math.tanh %270 : vector<2x32xf32>
    %272 = vector.extract_strided_slice %257 {offsets = [0, 96], sizes = [2, 32], strides = [1, 1]} : vector<2x128xf32> to vector<2x32xf32>
    %273 = arith.negf %272 : vector<2x32xf32>
    %274 = math.exp %273 : vector<2x32xf32>
    %cst_78 = arith.constant 1.000000e+00 : f32
    %275 = vector.broadcast %cst_78 : f32 to vector<2x32xf32>
    %276 = arith.addf %275, %274 : vector<2x32xf32>
    %277 = arith.divf %275, %276 : vector<2x32xf32>
    %278 = arith.mulf %269, %246 : vector<2x32xf32>
    %279 = arith.mulf %263, %271 : vector<2x32xf32>
    %280 = arith.addf %278, %279 : vector<2x32xf32>
    %281 = math.tanh %280 : vector<2x32xf32>
    %282 = arith.mulf %277, %281 : vector<2x32xf32>
    %283 = arith.index_cast %c7_i32 : i32 to index
    %c0_79 = arith.constant 0 : index
    %c0_80 = arith.constant 0 : index
    %284 = vector.load %arg6[%283, %c0_79, %c0_80] : memref<8x2x32xf32, #tpu.memory_space<vmem>>, vector<1x2x32xf32>
    %285 = vector.shape_cast %284 : vector<1x2x32xf32> to vector<2x32xf32>
    %286 = vector.shape_cast %282 : vector<2x32xf32> to vector<1x2x32xf32>
    tpu.vector_store %arg6[%283, %c0_79, %c0_80], %286 {strides = array<i32>} : memref<8x2x32xf32, #tpu.memory_space<vmem>>, vector<1x2x32xf32>,
    %c8_i32 = arith.constant 8 : i32
    %c0_81 = arith.constant 0 : index
    %c0_82 = arith.constant 0 : index
    %287 = vector.load %arg8[%c0_81, %c0_82] : memref<2x32xf32, #tpu.memory_space<vmem>>, vector<2x32xf32>
    tpu.vector_store %arg8[%c0_81, %c0_82], %282 {strides = array<i32>} : memref<2x32xf32, #tpu.memory_space<vmem>>, vector<2x32xf32>,
    %c0_83 = arith.constant 0 : index
    %c0_84 = arith.constant 0 : index
    %288 = vector.load %arg9[%c0_83, %c0_84] : memref<2x32xf32, #tpu.memory_space<vmem>>, vector<2x32xf32>
    tpu.vector_store %arg9[%c0_83, %c0_84], %280 {strides = array<i32>} : memref<2x32xf32, #tpu.memory_space<vmem>>, vector<2x32xf32>,
    return
  }
  func.func @transform_0(%arg0: i32, %arg1: i32) -> (i32, i32, i32) {
    %c0_i32 = arith.constant 0 : i32
    %c0_i32_0 = arith.constant 0 : i32
    return %arg1, %arg0, %c0_i32 : i32, i32, i32
  }
  func.func @transform_1(%arg0: i32, %arg1: i32) -> (i32, i32) {
    %c0_i32 = arith.constant 0 : i32
    %c0_i32_0 = arith.constant 0 : i32
    %c0_i32_1 = arith.constant 0 : i32
    return %c0_i32, %c0_i32_0 : i32, i32
  }
  func.func @transform_2(%arg0: i32, %arg1: i32) -> (i32, i32) {
    %c0_i32 = arith.constant 0 : i32
    %c0_i32_0 = arith.constant 0 : i32
    %c0_i32_1 = arith.constant 0 : i32
    return %c0_i32, %c0_i32_0 : i32, i32
  }
  func.func @transform_3(%arg0: i32, %arg1: i32) -> (i32, i32) {
    %c0_i32 = arith.constant 0 : i32
    %c0_i32_0 = arith.constant 0 : i32
    %c0_i32_1 = arith.constant 0 : i32
    return %c0_i32, %c0_i32_0 : i32, i32
  }
  func.func @transform_4(%arg0: i32, %arg1: i32) -> (i32, i32, i32) {
    %c0_i32 = arith.constant 0 : i32
    %c0_i32_0 = arith.constant 0 : i32
    return %arg1, %arg0, %c0_i32 : i32, i32, i32
  }
}

module attributes {stable_mosaic.version = 11 : i64} {
  func.func @_lstm_chunk_kernel(%arg0: i32, %arg1: i32, %arg2: memref<8x2x32xf32, #tpu.memory_space<vmem>>, %arg3: memref<32x128xf32, #tpu.memory_space<vmem>>, %arg4: memref<32x128xf32, #tpu.memory_space<vmem>>, %arg5: memref<1x128xf32, #tpu.memory_space<vmem>>, %arg6: memref<8x2x32xf32, #tpu.memory_space<vmem>>, %arg7: memref<8x2x128xf32, #tpu.memory_space<vmem>>, %arg8: memref<2x32xf32, #tpu.memory_space<vmem>>, %arg9: memref<2x32xf32, #tpu.memory_space<vmem>>) attributes {dimension_semantics = [#tpu.dimension_semantics<parallel>, #tpu.dimension_semantics<arbitrary>], iteration_bounds = array<i64: 1, 2>, scalar_prefetch = 0 : i64, scratch_operands = 3 : i64, tpu.core_type = #tpu.core_type<tc>, window_params = [{transform_indices = @transform_0, window_bounds = array<i64: 8, 2, 32>}, {pipeline_mode = #tpu.pipeline_mode<synchronous>, transform_indices = @transform_1, window_bounds = array<i64: 32, 128>}, {pipeline_mode = #tpu.pipeline_mode<synchronous>, transform_indices = @transform_2, window_bounds = array<i64: 32, 128>}, {pipeline_mode = #tpu.pipeline_mode<synchronous>, transform_indices = @transform_3, window_bounds = array<i64: 1, 128>}, {transform_indices = @transform_4, window_bounds = array<i64: 8, 2, 32>}]} {
    %c0_i32 = arith.constant 0 : i32
    %0 = arith.cmpi eq, %arg1, %c0_i32 : i32
    %1 = arith.extui %0 : i1 to i32
    %c0_i32_0 = arith.constant 0 : i32
    %2 = arith.cmpi ne, %1, %c0_i32_0 : i32
    scf.if %2 {
      %cst_85 = arith.constant 0.000000e+00 : f32
      %289 = vector.broadcast %cst_85 : f32 to vector<2x32xf32>
      %c0_86 = arith.constant 0 : index
      %c0_87 = arith.constant 0 : index
      %290 = vector.load %arg8[%c0_86, %c0_87] : memref<2x32xf32, #tpu.memory_space<vmem>>, vector<2x32xf32>
      tpu.vector_store %arg8[%c0_86, %c0_87], %289 {strides = array<i32>} : memref<2x32xf32, #tpu.memory_space<vmem>>, vector<2x32xf32>,
      %cst_88 = arith.constant 0.000000e+00 : f32
      %291 = vector.broadcast %cst_88 : f32 to vector<2x32xf32>
      %c0_89 = arith.constant 0 : index
      %c0_90 = arith.constant 0 : index
      %292 = vector.load %arg9[%c0_89, %c0_90] : memref<2x32xf32, #tpu.memory_space<vmem>>, vector<2x32xf32>
      tpu.vector_store %arg9[%c0_89, %c0_90], %291 {strides = array<i32>} : memref<2x32xf32, #tpu.memory_space<vmem>>, vector<2x32xf32>,
    } else {
    }
    %c0 = arith.constant 0 : index
    %c0_1 = arith.constant 0 : index
    %3 = vector.load %arg3[%c0, %c0_1] : memref<32x128xf32, #tpu.memory_space<vmem>>, vector<32x128xf32>
    %c0_2 = arith.constant 0 : index
    %c0_3 = arith.constant 0 : index
    %4 = vector.load %arg4[%c0_2, %c0_3] : memref<32x128xf32, #tpu.memory_space<vmem>>, vector<32x128xf32>
    %c0_4 = arith.constant 0 : index
    %c0_5 = arith.constant 0 : index
    %5 = vector.load %arg5[%c0_4, %c0_5] : memref<1x128xf32, #tpu.memory_space<vmem>>, vector<1x128xf32>
    %c0_6 = arith.constant 0 : index
    %c0_7 = arith.constant 0 : index
    %c0_8 = arith.constant 0 : index
    %6 = vector.load %arg2[%c0_6, %c0_7, %c0_8] : memref<8x2x32xf32, #tpu.memory_space<vmem>>, vector<8x2x32xf32>
    %7 = vector.shape_cast %6 : vector<8x2x32xf32> to vector<16x32xf32>
    %cst = arith.constant dense<0.000000e+00> : vector<16x128xf32>
    %8 = tpu.matmul %7, %3, %cst {dimension_numbers = #tpu.dot_dimension_numbers<[1], [0], [0], [1], [0, 0, 1, 1], [], []>} : vector<16x32xf32>, vector<32x128xf32>, vector<16x128xf32> -> vector<16x128xf32>
    %9 = vector.broadcast %5 : vector<1x128xf32> to vector<16x128xf32>
    %10 = arith.addf %8, %9 : vector<16x128xf32>
    %11 = vector.shape_cast %10 : vector<16x128xf32> to vector<8x2x128xf32>
    %c0_9 = arith.constant 0 : index
    %c0_10 = arith.constant 0 : index
    %c0_11 = arith.constant 0 : index
    %12 = vector.load %arg7[%c0_9, %c0_10, %c0_11] : memref<8x2x128xf32, #tpu.memory_space<vmem>>, vector<8x2x128xf32>
    tpu.vector_store %arg7[%c0_9, %c0_10, %c0_11], %11 {strides = array<i32>} : memref<8x2x128xf32, #tpu.memory_space<vmem>>, vector<8x2x128xf32>,
    %c0_12 = arith.constant 0 : index
    %c0_13 = arith.constant 0 : index
    %13 = vector.load %arg8[%c0_12, %c0_13] : memref<2x32xf32, #tpu.memory_space<vmem>>, vector<2x32xf32>
    %c0_14 = arith.constant 0 : index
    %c0_15 = arith.constant 0 : index
    %14 = vector.load %arg9[%c0_14, %c0_15] : memref<2x32xf32, #tpu.memory_space<vmem>>, vector<2x32xf32>
    %c0_i32_16 = arith.constant 0 : i32
    %15 = arith.index_cast %c0_i32_16 : i32 to index
    %c0_17 = arith.constant 0 : index
    %c0_18 = arith.constant 0 : index
    %16 = vector.load %arg7[%15, %c0_17, %c0_18] : memref<8x2x128xf32, #tpu.memory_space<vmem>>, vector<1x2x128xf32>
    %17 = vector.shape_cast %16 : vector<1x2x128xf32> to vector<2x128xf32>
    %cst_19 = arith.constant dense<0.000000e+00> : vector<2x128xf32>
    %18 = tpu.matmul %13, %4, %cst_19 {dimension_numbers = #tpu.dot_dimension_numbers<[1], [0], [0], [1], [0, 0, 1, 1], [], []>} : vector<2x32xf32>, vector<32x128xf32>, vector<2x128xf32> -> vector<2x128xf32>
    %19 = arith.addf %17, %18 : vector<2x128xf32>
    %20 = vector.extract_strided_slice %19 {offsets = [0, 0], sizes = [2, 32], strides = [1, 1]} : vector<2x128xf32> to vector<2x32xf32>
    %21 = arith.negf %20 : vector<2x32xf32>
    %22 = math.exp %21 : vector<2x32xf32>
    %cst_20 = arith.constant 1.000000e+00 : f32
    %23 = vector.broadcast %cst_20 : f32 to vector<2x32xf32>
    %24 = arith.addf %23, %22 : vector<2x32xf32>
    %25 = arith.divf %23, %24 : vector<2x32xf32>
    %26 = vector.extract_strided_slice %19 {offsets = [0, 32], sizes = [2, 32], strides = [1, 1]} : vector<2x128xf32> to vector<2x32xf32>
    %27 = arith.negf %26 : vector<2x32xf32>
    %28 = math.exp %27 : vector<2x32xf32>
    %cst_21 = arith.constant 1.000000e+00 : f32
    %29 = vector.broadcast %cst_21 : f32 to vector<2x32xf32>
    %30 = arith.addf %29, %28 : vector<2x32xf32>
    %31 = arith.divf %29, %30 : vector<2x32xf32>
    %32 = vector.extract_strided_slice %19 {offsets = [0, 64], sizes = [2, 32], strides = [1, 1]} : vector<2x128xf32> to vector<2x32xf32>
    %33 = math.tanh %32 : vector<2x32xf32>
    %34 = vector.extract_strided_slice %19 {offsets = [0, 96], sizes = [2, 32], strides = [1, 1]} : vector<2x128xf32> to vector<2x32xf32>
    %35 = arith.negf %34 : vector<2x32xf32>
    %36 = math.exp %35 : vector<2x32xf32>
    %cst_22 = arith.constant 1.000000e+00 : f32
    %37 = vector.broadcast %cst_22 : f32 to vector<2x32xf32>
    %38 = arith.addf %37, %36 : vector<2x32xf32>
    %39 = arith.divf %37, %38 : vector<2x32xf32>
    %40 = arith.mulf %31, %14 : vector<2x32xf32>
    %41 = arith.mulf %25, %33 : vector<2x32xf32>
    %42 = arith.addf %40, %41 : vector<2x32xf32>
    %43 = math.tanh %42 : vector<2x32xf32>
    %44 = arith.mulf %39, %43 : vector<2x32xf32>
    %45 = arith.index_cast %c0_i32_16 : i32 to index
    %c0_23 = arith.constant 0 : index
    %c0_24 = arith.constant 0 : index
    %46 = vector.load %arg6[%45, %c0_23, %c0_24] : memref<8x2x32xf32, #tpu.memory_space<vmem>>, vector<1x2x32xf32>
    %47 = vector.shape_cast %46 : vector<1x2x32xf32> to vector<2x32xf32>
    %48 = vector.shape_cast %44 : vector<2x32xf32> to vector<1x2x32xf32>
    tpu.vector_store %arg6[%45, %c0_23, %c0_24], %48 {strides = array<i32>} : memref<8x2x32xf32, #tpu.memory_space<vmem>>, vector<1x2x32xf32>,
    %c1_i32 = arith.constant 1 : i32
    %49 = arith.index_cast %c1_i32 : i32 to index
    %c0_25 = arith.constant 0 : index
    %c0_26 = arith.constant 0 : index
    %50 = vector.load %arg7[%49, %c0_25, %c0_26] : memref<8x2x128xf32, #tpu.memory_space<vmem>>, vector<1x2x128xf32>
    %51 = vector.shape_cast %50 : vector<1x2x128xf32> to vector<2x128xf32>
    %cst_27 = arith.constant dense<0.000000e+00> : vector<2x128xf32>
    %52 = tpu.matmul %44, %4, %cst_27 {dimension_numbers = #tpu.dot_dimension_numbers<[1], [0], [0], [1], [0, 0, 1, 1], [], []>} : vector<2x32xf32>, vector<32x128xf32>, vector<2x128xf32> -> vector<2x128xf32>
    %53 = arith.addf %51, %52 : vector<2x128xf32>
    %54 = vector.extract_strided_slice %53 {offsets = [0, 0], sizes = [2, 32], strides = [1, 1]} : vector<2x128xf32> to vector<2x32xf32>
    %55 = arith.negf %54 : vector<2x32xf32>
    %56 = math.exp %55 : vector<2x32xf32>
    %cst_28 = arith.constant 1.000000e+00 : f32
    %57 = vector.broadcast %cst_28 : f32 to vector<2x32xf32>
    %58 = arith.addf %57, %56 : vector<2x32xf32>
    %59 = arith.divf %57, %58 : vector<2x32xf32>
    %60 = vector.extract_strided_slice %53 {offsets = [0, 32], sizes = [2, 32], strides = [1, 1]} : vector<2x128xf32> to vector<2x32xf32>
    %61 = arith.negf %60 : vector<2x32xf32>
    %62 = math.exp %61 : vector<2x32xf32>
    %cst_29 = arith.constant 1.000000e+00 : f32
    %63 = vector.broadcast %cst_29 : f32 to vector<2x32xf32>
    %64 = arith.addf %63, %62 : vector<2x32xf32>
    %65 = arith.divf %63, %64 : vector<2x32xf32>
    %66 = vector.extract_strided_slice %53 {offsets = [0, 64], sizes = [2, 32], strides = [1, 1]} : vector<2x128xf32> to vector<2x32xf32>
    %67 = math.tanh %66 : vector<2x32xf32>
    %68 = vector.extract_strided_slice %53 {offsets = [0, 96], sizes = [2, 32], strides = [1, 1]} : vector<2x128xf32> to vector<2x32xf32>
    %69 = arith.negf %68 : vector<2x32xf32>
    %70 = math.exp %69 : vector<2x32xf32>
    %cst_30 = arith.constant 1.000000e+00 : f32
    %71 = vector.broadcast %cst_30 : f32 to vector<2x32xf32>
    %72 = arith.addf %71, %70 : vector<2x32xf32>
    %73 = arith.divf %71, %72 : vector<2x32xf32>
    %74 = arith.mulf %65, %42 : vector<2x32xf32>
    %75 = arith.mulf %59, %67 : vector<2x32xf32>
    %76 = arith.addf %74, %75 : vector<2x32xf32>
    %77 = math.tanh %76 : vector<2x32xf32>
    %78 = arith.mulf %73, %77 : vector<2x32xf32>
    %79 = arith.index_cast %c1_i32 : i32 to index
    %c0_31 = arith.constant 0 : index
    %c0_32 = arith.constant 0 : index
    %80 = vector.load %arg6[%79, %c0_31, %c0_32] : memref<8x2x32xf32, #tpu.memory_space<vmem>>, vector<1x2x32xf32>
    %81 = vector.shape_cast %80 : vector<1x2x32xf32> to vector<2x32xf32>
    %82 = vector.shape_cast %78 : vector<2x32xf32> to vector<1x2x32xf32>
    tpu.vector_store %arg6[%79, %c0_31, %c0_32], %82 {strides = array<i32>} : memref<8x2x32xf32, #tpu.memory_space<vmem>>, vector<1x2x32xf32>,
    %c2_i32 = arith.constant 2 : i32
    %83 = arith.index_cast %c2_i32 : i32 to index
    %c0_33 = arith.constant 0 : index
    %c0_34 = arith.constant 0 : index
    %84 = vector.load %arg7[%83, %c0_33, %c0_34] : memref<8x2x128xf32, #tpu.memory_space<vmem>>, vector<1x2x128xf32>
    %85 = vector.shape_cast %84 : vector<1x2x128xf32> to vector<2x128xf32>
    %cst_35 = arith.constant dense<0.000000e+00> : vector<2x128xf32>
    %86 = tpu.matmul %78, %4, %cst_35 {dimension_numbers = #tpu.dot_dimension_numbers<[1], [0], [0], [1], [0, 0, 1, 1], [], []>} : vector<2x32xf32>, vector<32x128xf32>, vector<2x128xf32> -> vector<2x128xf32>
    %87 = arith.addf %85, %86 : vector<2x128xf32>
    %88 = vector.extract_strided_slice %87 {offsets = [0, 0], sizes = [2, 32], strides = [1, 1]} : vector<2x128xf32> to vector<2x32xf32>
    %89 = arith.negf %88 : vector<2x32xf32>
    %90 = math.exp %89 : vector<2x32xf32>
    %cst_36 = arith.constant 1.000000e+00 : f32
    %91 = vector.broadcast %cst_36 : f32 to vector<2x32xf32>
    %92 = arith.addf %91, %90 : vector<2x32xf32>
    %93 = arith.divf %91, %92 : vector<2x32xf32>
    %94 = vector.extract_strided_slice %87 {offsets = [0, 32], sizes = [2, 32], strides = [1, 1]} : vector<2x128xf32> to vector<2x32xf32>
    %95 = arith.negf %94 : vector<2x32xf32>
    %96 = math.exp %95 : vector<2x32xf32>
    %cst_37 = arith.constant 1.000000e+00 : f32
    %97 = vector.broadcast %cst_37 : f32 to vector<2x32xf32>
    %98 = arith.addf %97, %96 : vector<2x32xf32>
    %99 = arith.divf %97, %98 : vector<2x32xf32>
    %100 = vector.extract_strided_slice %87 {offsets = [0, 64], sizes = [2, 32], strides = [1, 1]} : vector<2x128xf32> to vector<2x32xf32>
    %101 = math.tanh %100 : vector<2x32xf32>
    %102 = vector.extract_strided_slice %87 {offsets = [0, 96], sizes = [2, 32], strides = [1, 1]} : vector<2x128xf32> to vector<2x32xf32>
    %103 = arith.negf %102 : vector<2x32xf32>
    %104 = math.exp %103 : vector<2x32xf32>
    %cst_38 = arith.constant 1.000000e+00 : f32
    %105 = vector.broadcast %cst_38 : f32 to vector<2x32xf32>
    %106 = arith.addf %105, %104 : vector<2x32xf32>
    %107 = arith.divf %105, %106 : vector<2x32xf32>
    %108 = arith.mulf %99, %76 : vector<2x32xf32>
    %109 = arith.mulf %93, %101 : vector<2x32xf32>
    %110 = arith.addf %108, %109 : vector<2x32xf32>
    %111 = math.tanh %110 : vector<2x32xf32>
    %112 = arith.mulf %107, %111 : vector<2x32xf32>
    %113 = arith.index_cast %c2_i32 : i32 to index
    %c0_39 = arith.constant 0 : index
    %c0_40 = arith.constant 0 : index
    %114 = vector.load %arg6[%113, %c0_39, %c0_40] : memref<8x2x32xf32, #tpu.memory_space<vmem>>, vector<1x2x32xf32>
    %115 = vector.shape_cast %114 : vector<1x2x32xf32> to vector<2x32xf32>
    %116 = vector.shape_cast %112 : vector<2x32xf32> to vector<1x2x32xf32>
    tpu.vector_store %arg6[%113, %c0_39, %c0_40], %116 {strides = array<i32>} : memref<8x2x32xf32, #tpu.memory_space<vmem>>, vector<1x2x32xf32>,
    %c3_i32 = arith.constant 3 : i32
    %117 = arith.index_cast %c3_i32 : i32 to index
    %c0_41 = arith.constant 0 : index
    %c0_42 = arith.constant 0 : index
    %118 = vector.load %arg7[%117, %c0_41, %c0_42] : memref<8x2x128xf32, #tpu.memory_space<vmem>>, vector<1x2x128xf32>
    %119 = vector.shape_cast %118 : vector<1x2x128xf32> to vector<2x128xf32>
    %cst_43 = arith.constant dense<0.000000e+00> : vector<2x128xf32>
    %120 = tpu.matmul %112, %4, %cst_43 {dimension_numbers = #tpu.dot_dimension_numbers<[1], [0], [0], [1], [0, 0, 1, 1], [], []>} : vector<2x32xf32>, vector<32x128xf32>, vector<2x128xf32> -> vector<2x128xf32>
    %121 = arith.addf %119, %120 : vector<2x128xf32>
    %122 = vector.extract_strided_slice %121 {offsets = [0, 0], sizes = [2, 32], strides = [1, 1]} : vector<2x128xf32> to vector<2x32xf32>
    %123 = arith.negf %122 : vector<2x32xf32>
    %124 = math.exp %123 : vector<2x32xf32>
    %cst_44 = arith.constant 1.000000e+00 : f32
    %125 = vector.broadcast %cst_44 : f32 to vector<2x32xf32>
    %126 = arith.addf %125, %124 : vector<2x32xf32>
    %127 = arith.divf %125, %126 : vector<2x32xf32>
    %128 = vector.extract_strided_slice %121 {offsets = [0, 32], sizes = [2, 32], strides = [1, 1]} : vector<2x128xf32> to vector<2x32xf32>
    %129 = arith.negf %128 : vector<2x32xf32>
    %130 = math.exp %129 : vector<2x32xf32>
    %cst_45 = arith.constant 1.000000e+00 : f32
    %131 = vector.broadcast %cst_45 : f32 to vector<2x32xf32>
    %132 = arith.addf %131, %130 : vector<2x32xf32>
    %133 = arith.divf %131, %132 : vector<2x32xf32>
    %134 = vector.extract_strided_slice %121 {offsets = [0, 64], sizes = [2, 32], strides = [1, 1]} : vector<2x128xf32> to vector<2x32xf32>
    %135 = math.tanh %134 : vector<2x32xf32>
    %136 = vector.extract_strided_slice %121 {offsets = [0, 96], sizes = [2, 32], strides = [1, 1]} : vector<2x128xf32> to vector<2x32xf32>
    %137 = arith.negf %136 : vector<2x32xf32>
    %138 = math.exp %137 : vector<2x32xf32>
    %cst_46 = arith.constant 1.000000e+00 : f32
    %139 = vector.broadcast %cst_46 : f32 to vector<2x32xf32>
    %140 = arith.addf %139, %138 : vector<2x32xf32>
    %141 = arith.divf %139, %140 : vector<2x32xf32>
    %142 = arith.mulf %133, %110 : vector<2x32xf32>
    %143 = arith.mulf %127, %135 : vector<2x32xf32>
    %144 = arith.addf %142, %143 : vector<2x32xf32>
    %145 = math.tanh %144 : vector<2x32xf32>
    %146 = arith.mulf %141, %145 : vector<2x32xf32>
    %147 = arith.index_cast %c3_i32 : i32 to index
    %c0_47 = arith.constant 0 : index
    %c0_48 = arith.constant 0 : index
    %148 = vector.load %arg6[%147, %c0_47, %c0_48] : memref<8x2x32xf32, #tpu.memory_space<vmem>>, vector<1x2x32xf32>
    %149 = vector.shape_cast %148 : vector<1x2x32xf32> to vector<2x32xf32>
    %150 = vector.shape_cast %146 : vector<2x32xf32> to vector<1x2x32xf32>
    tpu.vector_store %arg6[%147, %c0_47, %c0_48], %150 {strides = array<i32>} : memref<8x2x32xf32, #tpu.memory_space<vmem>>, vector<1x2x32xf32>,
    %c4_i32 = arith.constant 4 : i32
    %151 = arith.index_cast %c4_i32 : i32 to index
    %c0_49 = arith.constant 0 : index
    %c0_50 = arith.constant 0 : index
    %152 = vector.load %arg7[%151, %c0_49, %c0_50] : memref<8x2x128xf32, #tpu.memory_space<vmem>>, vector<1x2x128xf32>
    %153 = vector.shape_cast %152 : vector<1x2x128xf32> to vector<2x128xf32>
    %cst_51 = arith.constant dense<0.000000e+00> : vector<2x128xf32>
    %154 = tpu.matmul %146, %4, %cst_51 {dimension_numbers = #tpu.dot_dimension_numbers<[1], [0], [0], [1], [0, 0, 1, 1], [], []>} : vector<2x32xf32>, vector<32x128xf32>, vector<2x128xf32> -> vector<2x128xf32>
    %155 = arith.addf %153, %154 : vector<2x128xf32>
    %156 = vector.extract_strided_slice %155 {offsets = [0, 0], sizes = [2, 32], strides = [1, 1]} : vector<2x128xf32> to vector<2x32xf32>
    %157 = arith.negf %156 : vector<2x32xf32>
    %158 = math.exp %157 : vector<2x32xf32>
    %cst_52 = arith.constant 1.000000e+00 : f32
    %159 = vector.broadcast %cst_52 : f32 to vector<2x32xf32>
    %160 = arith.addf %159, %158 : vector<2x32xf32>
    %161 = arith.divf %159, %160 : vector<2x32xf32>
    %162 = vector.extract_strided_slice %155 {offsets = [0, 32], sizes = [2, 32], strides = [1, 1]} : vector<2x128xf32> to vector<2x32xf32>
    %163 = arith.negf %162 : vector<2x32xf32>
    %164 = math.exp %163 : vector<2x32xf32>
    %cst_53 = arith.constant 1.000000e+00 : f32
    %165 = vector.broadcast %cst_53 : f32 to vector<2x32xf32>
    %166 = arith.addf %165, %164 : vector<2x32xf32>
    %167 = arith.divf %165, %166 : vector<2x32xf32>
    %168 = vector.extract_strided_slice %155 {offsets = [0, 64], sizes = [2, 32], strides = [1, 1]} : vector<2x128xf32> to vector<2x32xf32>
    %169 = math.tanh %168 : vector<2x32xf32>
    %170 = vector.extract_strided_slice %155 {offsets = [0, 96], sizes = [2, 32], strides = [1, 1]} : vector<2x128xf32> to vector<2x32xf32>
    %171 = arith.negf %170 : vector<2x32xf32>
    %172 = math.exp %171 : vector<2x32xf32>
    %cst_54 = arith.constant 1.000000e+00 : f32
    %173 = vector.broadcast %cst_54 : f32 to vector<2x32xf32>
    %174 = arith.addf %173, %172 : vector<2x32xf32>
    %175 = arith.divf %173, %174 : vector<2x32xf32>
    %176 = arith.mulf %167, %144 : vector<2x32xf32>
    %177 = arith.mulf %161, %169 : vector<2x32xf32>
    %178 = arith.addf %176, %177 : vector<2x32xf32>
    %179 = math.tanh %178 : vector<2x32xf32>
    %180 = arith.mulf %175, %179 : vector<2x32xf32>
    %181 = arith.index_cast %c4_i32 : i32 to index
    %c0_55 = arith.constant 0 : index
    %c0_56 = arith.constant 0 : index
    %182 = vector.load %arg6[%181, %c0_55, %c0_56] : memref<8x2x32xf32, #tpu.memory_space<vmem>>, vector<1x2x32xf32>
    %183 = vector.shape_cast %182 : vector<1x2x32xf32> to vector<2x32xf32>
    %184 = vector.shape_cast %180 : vector<2x32xf32> to vector<1x2x32xf32>
    tpu.vector_store %arg6[%181, %c0_55, %c0_56], %184 {strides = array<i32>} : memref<8x2x32xf32, #tpu.memory_space<vmem>>, vector<1x2x32xf32>,
    %c5_i32 = arith.constant 5 : i32
    %185 = arith.index_cast %c5_i32 : i32 to index
    %c0_57 = arith.constant 0 : index
    %c0_58 = arith.constant 0 : index
    %186 = vector.load %arg7[%185, %c0_57, %c0_58] : memref<8x2x128xf32, #tpu.memory_space<vmem>>, vector<1x2x128xf32>
    %187 = vector.shape_cast %186 : vector<1x2x128xf32> to vector<2x128xf32>
    %cst_59 = arith.constant dense<0.000000e+00> : vector<2x128xf32>
    %188 = tpu.matmul %180, %4, %cst_59 {dimension_numbers = #tpu.dot_dimension_numbers<[1], [0], [0], [1], [0, 0, 1, 1], [], []>} : vector<2x32xf32>, vector<32x128xf32>, vector<2x128xf32> -> vector<2x128xf32>
    %189 = arith.addf %187, %188 : vector<2x128xf32>
    %190 = vector.extract_strided_slice %189 {offsets = [0, 0], sizes = [2, 32], strides = [1, 1]} : vector<2x128xf32> to vector<2x32xf32>
    %191 = arith.negf %190 : vector<2x32xf32>
    %192 = math.exp %191 : vector<2x32xf32>
    %cst_60 = arith.constant 1.000000e+00 : f32
    %193 = vector.broadcast %cst_60 : f32 to vector<2x32xf32>
    %194 = arith.addf %193, %192 : vector<2x32xf32>
    %195 = arith.divf %193, %194 : vector<2x32xf32>
    %196 = vector.extract_strided_slice %189 {offsets = [0, 32], sizes = [2, 32], strides = [1, 1]} : vector<2x128xf32> to vector<2x32xf32>
    %197 = arith.negf %196 : vector<2x32xf32>
    %198 = math.exp %197 : vector<2x32xf32>
    %cst_61 = arith.constant 1.000000e+00 : f32
    %199 = vector.broadcast %cst_61 : f32 to vector<2x32xf32>
    %200 = arith.addf %199, %198 : vector<2x32xf32>
    %201 = arith.divf %199, %200 : vector<2x32xf32>
    %202 = vector.extract_strided_slice %189 {offsets = [0, 64], sizes = [2, 32], strides = [1, 1]} : vector<2x128xf32> to vector<2x32xf32>
    %203 = math.tanh %202 : vector<2x32xf32>
    %204 = vector.extract_strided_slice %189 {offsets = [0, 96], sizes = [2, 32], strides = [1, 1]} : vector<2x128xf32> to vector<2x32xf32>
    %205 = arith.negf %204 : vector<2x32xf32>
    %206 = math.exp %205 : vector<2x32xf32>
    %cst_62 = arith.constant 1.000000e+00 : f32
    %207 = vector.broadcast %cst_62 : f32 to vector<2x32xf32>
    %208 = arith.addf %207, %206 : vector<2x32xf32>
    %209 = arith.divf %207, %208 : vector<2x32xf32>
    %210 = arith.mulf %201, %178 : vector<2x32xf32>
    %211 = arith.mulf %195, %203 : vector<2x32xf32>
    %212 = arith.addf %210, %211 : vector<2x32xf32>
    %213 = math.tanh %212 : vector<2x32xf32>
    %214 = arith.mulf %209, %213 : vector<2x32xf32>
    %215 = arith.index_cast %c5_i32 : i32 to index
    %c0_63 = arith.constant 0 : index
    %c0_64 = arith.constant 0 : index
    %216 = vector.load %arg6[%215, %c0_63, %c0_64] : memref<8x2x32xf32, #tpu.memory_space<vmem>>, vector<1x2x32xf32>
    %217 = vector.shape_cast %216 : vector<1x2x32xf32> to vector<2x32xf32>
    %218 = vector.shape_cast %214 : vector<2x32xf32> to vector<1x2x32xf32>
    tpu.vector_store %arg6[%215, %c0_63, %c0_64], %218 {strides = array<i32>} : memref<8x2x32xf32, #tpu.memory_space<vmem>>, vector<1x2x32xf32>,
    %c6_i32 = arith.constant 6 : i32
    %219 = arith.index_cast %c6_i32 : i32 to index
    %c0_65 = arith.constant 0 : index
    %c0_66 = arith.constant 0 : index
    %220 = vector.load %arg7[%219, %c0_65, %c0_66] : memref<8x2x128xf32, #tpu.memory_space<vmem>>, vector<1x2x128xf32>
    %221 = vector.shape_cast %220 : vector<1x2x128xf32> to vector<2x128xf32>
    %cst_67 = arith.constant dense<0.000000e+00> : vector<2x128xf32>
    %222 = tpu.matmul %214, %4, %cst_67 {dimension_numbers = #tpu.dot_dimension_numbers<[1], [0], [0], [1], [0, 0, 1, 1], [], []>} : vector<2x32xf32>, vector<32x128xf32>, vector<2x128xf32> -> vector<2x128xf32>
    %223 = arith.addf %221, %222 : vector<2x128xf32>
    %224 = vector.extract_strided_slice %223 {offsets = [0, 0], sizes = [2, 32], strides = [1, 1]} : vector<2x128xf32> to vector<2x32xf32>
    %225 = arith.negf %224 : vector<2x32xf32>
    %226 = math.exp %225 : vector<2x32xf32>
    %cst_68 = arith.constant 1.000000e+00 : f32
    %227 = vector.broadcast %cst_68 : f32 to vector<2x32xf32>
    %228 = arith.addf %227, %226 : vector<2x32xf32>
    %229 = arith.divf %227, %228 : vector<2x32xf32>
    %230 = vector.extract_strided_slice %223 {offsets = [0, 32], sizes = [2, 32], strides = [1, 1]} : vector<2x128xf32> to vector<2x32xf32>
    %231 = arith.negf %230 : vector<2x32xf32>
    %232 = math.exp %231 : vector<2x32xf32>
    %cst_69 = arith.constant 1.000000e+00 : f32
    %233 = vector.broadcast %cst_69 : f32 to vector<2x32xf32>
    %234 = arith.addf %233, %232 : vector<2x32xf32>
    %235 = arith.divf %233, %234 : vector<2x32xf32>
    %236 = vector.extract_strided_slice %223 {offsets = [0, 64], sizes = [2, 32], strides = [1, 1]} : vector<2x128xf32> to vector<2x32xf32>
    %237 = math.tanh %236 : vector<2x32xf32>
    %238 = vector.extract_strided_slice %223 {offsets = [0, 96], sizes = [2, 32], strides = [1, 1]} : vector<2x128xf32> to vector<2x32xf32>
    %239 = arith.negf %238 : vector<2x32xf32>
    %240 = math.exp %239 : vector<2x32xf32>
    %cst_70 = arith.constant 1.000000e+00 : f32
    %241 = vector.broadcast %cst_70 : f32 to vector<2x32xf32>
    %242 = arith.addf %241, %240 : vector<2x32xf32>
    %243 = arith.divf %241, %242 : vector<2x32xf32>
    %244 = arith.mulf %235, %212 : vector<2x32xf32>
    %245 = arith.mulf %229, %237 : vector<2x32xf32>
    %246 = arith.addf %244, %245 : vector<2x32xf32>
    %247 = math.tanh %246 : vector<2x32xf32>
    %248 = arith.mulf %243, %247 : vector<2x32xf32>
    %249 = arith.index_cast %c6_i32 : i32 to index
    %c0_71 = arith.constant 0 : index
    %c0_72 = arith.constant 0 : index
    %250 = vector.load %arg6[%249, %c0_71, %c0_72] : memref<8x2x32xf32, #tpu.memory_space<vmem>>, vector<1x2x32xf32>
    %251 = vector.shape_cast %250 : vector<1x2x32xf32> to vector<2x32xf32>
    %252 = vector.shape_cast %248 : vector<2x32xf32> to vector<1x2x32xf32>
    tpu.vector_store %arg6[%249, %c0_71, %c0_72], %252 {strides = array<i32>} : memref<8x2x32xf32, #tpu.memory_space<vmem>>, vector<1x2x32xf32>,
    %c7_i32 = arith.constant 7 : i32
    %253 = arith.index_cast %c7_i32 : i32 to index
    %c0_73 = arith.constant 0 : index
    %c0_74 = arith.constant 0 : index
    %254 = vector.load %arg7[%253, %c0_73, %c0_74] : memref<8x2x128xf32, #tpu.memory_space<vmem>>, vector<1x2x128xf32>
    %255 = vector.shape_cast %254 : vector<1x2x128xf32> to vector<2x128xf32>
    %cst_75 = arith.constant dense<0.000000e+00> : vector<2x128xf32>
    %256 = tpu.matmul %248, %4, %cst_75 {dimension_numbers = #tpu.dot_dimension_numbers<[1], [0], [0], [1], [0, 0, 1, 1], [], []>} : vector<2x32xf32>, vector<32x128xf32>, vector<2x128xf32> -> vector<2x128xf32>
    %257 = arith.addf %255, %256 : vector<2x128xf32>
    %258 = vector.extract_strided_slice %257 {offsets = [0, 0], sizes = [2, 32], strides = [1, 1]} : vector<2x128xf32> to vector<2x32xf32>
    %259 = arith.negf %258 : vector<2x32xf32>
    %260 = math.exp %259 : vector<2x32xf32>
    %cst_76 = arith.constant 1.000000e+00 : f32
    %261 = vector.broadcast %cst_76 : f32 to vector<2x32xf32>
    %262 = arith.addf %261, %260 : vector<2x32xf32>
    %263 = arith.divf %261, %262 : vector<2x32xf32>
    %264 = vector.extract_strided_slice %257 {offsets = [0, 32], sizes = [2, 32], strides = [1, 1]} : vector<2x128xf32> to vector<2x32xf32>
    %265 = arith.negf %264 : vector<2x32xf32>
    %266 = math.exp %265 : vector<2x32xf32>
    %cst_77 = arith.constant 1.000000e+00 : f32
    %267 = vector.broadcast %cst_77 : f32 to vector<2x32xf32>
    %268 = arith.addf %267, %266 : vector<2x32xf32>
    %269 = arith.divf %267, %268 : vector<2x32xf32>
    %270 = vector.extract_strided_slice %257 {offsets = [0, 64], sizes = [2, 32], strides = [1, 1]} : vector<2x128xf32> to vector<2x32xf32>
    %271 = math.tanh %270 : vector<2x32xf32>
    %272 = vector.extract_strided_slice %257 {offsets = [0, 96], sizes = [2, 32], strides = [1, 1]} : vector<2x128xf32> to vector<2x32xf32>
    %273 = arith.negf %272 : vector<2x32xf32>
    %274 = math.exp %273 : vector<2x32xf32>
    %cst_78 = arith.constant 1.000000e+00 : f32
    %275 = vector.broadcast %cst_78 : f32 to vector<2x32xf32>
    %276 = arith.addf %275, %274 : vector<2x32xf32>
    %277 = arith.divf %275, %276 : vector<2x32xf32>
    %278 = arith.mulf %269, %246 : vector<2x32xf32>
    %279 = arith.mulf %263, %271 : vector<2x32xf32>
    %280 = arith.addf %278, %279 : vector<2x32xf32>
    %281 = math.tanh %280 : vector<2x32xf32>
    %282 = arith.mulf %277, %281 : vector<2x32xf32>
    %283 = arith.index_cast %c7_i32 : i32 to index
    %c0_79 = arith.constant 0 : index
    %c0_80 = arith.constant 0 : index
    %284 = vector.load %arg6[%283, %c0_79, %c0_80] : memref<8x2x32xf32, #tpu.memory_space<vmem>>, vector<1x2x32xf32>
    %285 = vector.shape_cast %284 : vector<1x2x32xf32> to vector<2x32xf32>
    %286 = vector.shape_cast %282 : vector<2x32xf32> to vector<1x2x32xf32>
    tpu.vector_store %arg6[%283, %c0_79, %c0_80], %286 {strides = array<i32>} : memref<8x2x32xf32, #tpu.memory_space<vmem>>, vector<1x2x32xf32>,
    %c8_i32 = arith.constant 8 : i32
    %c0_81 = arith.constant 0 : index
    %c0_82 = arith.constant 0 : index
    %287 = vector.load %arg8[%c0_81, %c0_82] : memref<2x32xf32, #tpu.memory_space<vmem>>, vector<2x32xf32>
    tpu.vector_store %arg8[%c0_81, %c0_82], %282 {strides = array<i32>} : memref<2x32xf32, #tpu.memory_space<vmem>>, vector<2x32xf32>,
    %c0_83 = arith.constant 0 : index
    %c0_84 = arith.constant 0 : index
    %288 = vector.load %arg9[%c0_83, %c0_84] : memref<2x32xf32, #tpu.memory_space<vmem>>, vector<2x32xf32>
    tpu.vector_store %arg9[%c0_83, %c0_84], %280 {strides = array<i32>} : memref<2x32xf32, #tpu.memory_space<vmem>>, vector<2x32xf32>,
    return
  }
  func.func @transform_0(%arg0: i32, %arg1: i32) -> (i32, i32, i32) {
    %c0_i32 = arith.constant 0 : i32
    %c0_i32_0 = arith.constant 0 : i32
    return %arg1, %arg0, %c0_i32 : i32, i32, i32
  }
  func.func @transform_1(%arg0: i32, %arg1: i32) -> (i32, i32) {
    %c0_i32 = arith.constant 0 : i32
    %c0_i32_0 = arith.constant 0 : i32
    %c0_i32_1 = arith.constant 0 : i32
    return %c0_i32, %c0_i32_0 : i32, i32
  }
  func.func @transform_2(%arg0: i32, %arg1: i32) -> (i32, i32) {
    %c0_i32 = arith.constant 0 : i32
    %c0_i32_0 = arith.constant 0 : i32
    %c0_i32_1 = arith.constant 0 : i32
    return %c0_i32, %c0_i32_0 : i32, i32
  }
  func.func @transform_3(%arg0: i32, %arg1: i32) -> (i32, i32) {
    %c0_i32 = arith.constant 0 : i32
    %c0_i32_0 = arith.constant 0 : i32
    %c0_i32_1 = arith.constant 0 : i32
    return %c0_i32, %c0_i32_0 : i32, i32
  }
  func.func @transform_4(%arg0: i32, %arg1: i32) -> (i32, i32, i32) {
    %c0_i32 = arith.constant 0 : i32
    %c0_i32_0 = arith.constant 0 : i32
    return %arg1, %arg0, %c0_i32 : i32, i32, i32
  }
}

module attributes {stable_mosaic.version = 11 : i64} {
  func.func @_fc_softmax_kernel(%arg0: i32, %arg1: memref<16x2x32xf32, #tpu.memory_space<vmem>>, %arg2: memref<32x4xf32, #tpu.memory_space<vmem>>, %arg3: memref<1x4xf32, #tpu.memory_space<vmem>>, %arg4: memref<16x2x4xf32, #tpu.memory_space<vmem>>) attributes {dimension_semantics = [#tpu.dimension_semantics<parallel>], iteration_bounds = array<i64: 1>, scalar_prefetch = 0 : i64, scratch_operands = 0 : i64, tpu.core_type = #tpu.core_type<tc>, window_params = [{transform_indices = @transform_0, window_bounds = array<i64: 16, 2, 32>}, {pipeline_mode = #tpu.pipeline_mode<synchronous>, transform_indices = @transform_1, window_bounds = array<i64: 32, 4>}, {pipeline_mode = #tpu.pipeline_mode<synchronous>, transform_indices = @transform_2, window_bounds = array<i64: 1, 4>}, {transform_indices = @transform_3, window_bounds = array<i64: 16, 2, 4>}]} {
    %c0 = arith.constant 0 : index
    %c0_0 = arith.constant 0 : index
    %0 = vector.load %arg2[%c0, %c0_0] : memref<32x4xf32, #tpu.memory_space<vmem>>, vector<32x4xf32>
    %c0_1 = arith.constant 0 : index
    %c0_2 = arith.constant 0 : index
    %1 = vector.load %arg3[%c0_1, %c0_2] : memref<1x4xf32, #tpu.memory_space<vmem>>, vector<1x4xf32>
    %c0_3 = arith.constant 0 : index
    %c0_4 = arith.constant 0 : index
    %c0_5 = arith.constant 0 : index
    %2 = vector.load %arg1[%c0_3, %c0_4, %c0_5] : memref<16x2x32xf32, #tpu.memory_space<vmem>>, vector<16x2x32xf32>
    %3 = vector.shape_cast %2 : vector<16x2x32xf32> to vector<32x32xf32>
    %cst = arith.constant dense<0.000000e+00> : vector<32x4xf32>
    %4 = tpu.matmul %3, %0, %cst {dimension_numbers = #tpu.dot_dimension_numbers<[1], [0], [0], [1], [0, 0, 1, 1], [], []>} : vector<32x32xf32>, vector<32x4xf32>, vector<32x4xf32> -> vector<32x4xf32>
    %5 = vector.broadcast %1 : vector<1x4xf32> to vector<32x4xf32>
    %6 = arith.addf %4, %5 : vector<32x4xf32>
    %7 = vector.shape_cast %6 : vector<32x4xf32> to vector<16x2x4xf32>
    %cst_6 = arith.constant dense<0xFF800000> : vector<2x4xf32>
    %8 = vector.multi_reduction <maximumf>, %7, %cst_6 [0] : vector<16x2x4xf32> to vector<2x4xf32>
    %9 = vector.shape_cast %8 : vector<2x4xf32> to vector<1x2x4xf32>
    %10 = vector.broadcast %9 : vector<1x2x4xf32> to vector<16x2x4xf32>
    %11 = arith.subf %7, %10 : vector<16x2x4xf32>
    %12 = math.exp %11 : vector<16x2x4xf32>
    %cst_7 = arith.constant dense<0.000000e+00> : vector<2x4xf32>
    %13 = vector.multi_reduction <add>, %12, %cst_7 [0] : vector<16x2x4xf32> to vector<2x4xf32>
    %14 = vector.shape_cast %13 : vector<2x4xf32> to vector<1x2x4xf32>
    %15 = vector.broadcast %14 : vector<1x2x4xf32> to vector<16x2x4xf32>
    %16 = arith.divf %12, %15 : vector<16x2x4xf32>
    %c0_8 = arith.constant 0 : index
    %c0_9 = arith.constant 0 : index
    %c0_10 = arith.constant 0 : index
    %17 = vector.load %arg4[%c0_8, %c0_9, %c0_10] : memref<16x2x4xf32, #tpu.memory_space<vmem>>, vector<16x2x4xf32>
    tpu.vector_store %arg4[%c0_8, %c0_9, %c0_10], %16 {strides = array<i32>} : memref<16x2x4xf32, #tpu.memory_space<vmem>>, vector<16x2x4xf32>,
    return
  }
  func.func @transform_0(%arg0: i32) -> (i32, i32, i32) {
    %c0_i32 = arith.constant 0 : i32
    %c0_i32_0 = arith.constant 0 : i32
    %c0_i32_1 = arith.constant 0 : i32
    return %c0_i32, %arg0, %c0_i32_0 : i32, i32, i32
  }
  func.func @transform_1(%arg0: i32) -> (i32, i32) {
    %c0_i32 = arith.constant 0 : i32
    %c0_i32_0 = arith.constant 0 : i32
    %c0_i32_1 = arith.constant 0 : i32
    return %c0_i32, %c0_i32_0 : i32, i32
  }
  func.func @transform_2(%arg0: i32) -> (i32, i32) {
    %c0_i32 = arith.constant 0 : i32
    %c0_i32_0 = arith.constant 0 : i32
    %c0_i32_1 = arith.constant 0 : i32
    return %c0_i32, %c0_i32_0 : i32, i32
  }
  func.func @transform_3(%arg0: i32) -> (i32, i32, i32) {
    %c0_i32 = arith.constant 0 : i32
    %c0_i32_0 = arith.constant 0 : i32
    %c0_i32_1 = arith.constant 0 : i32
    return %c0_i32, %arg0, %c0_i32_0 : i32, i32, i32
  }
}

</mosaic_0001>

<bundles_post_ra>
// kernel: lstm_classifier_forward.5
= control target key start
LH: loop header
LB: loop body
LE: loop exit
PB: predicated region body
PF: predicated region fallthrough
CT: control target
= control target key end

     0   :  { %v62_v0 = vlaneseq  ;;  %v529_v4 = vmov 1983009808   ;;  %vm125_vm0 = vcmask 261120   ;;  %vm307_vm1 = vcmask 25600   ;;  %s817_s1 = inlined_call_operand.vmem [shape: f32[32,4], index: 1, kind: input, shape index: {}]   ;;  %s818_s0 = inlined_call_operand.vmem [shape: f32[16,2,32], index: 0, kind: input, shape index: {}]   ;;  %s819_s2 = inlined_call_operand.vmem [shape: f32[1,4], index: 2, kind: input, shape index: {}]   ;;  %s820_s3 = inlined_call_operand.vmem [shape: f32[16,2,4], index: 3, kind: output, shape index: {}]  }
   0x1   :  { %v14_v1 = vld [vmem:[%s817_s1] sm:$0xff]  ;;  %v15_v2 = vld [vmem:[%s817_s1 + $0x8] sm:$0xff]  ;;  %v16_v3 = vld [vmem:[%s817_s1 + $0x10] sm:$0xff]  ;;  %v60_v5 = vunpack.c.l.s4 %v529_v4 }
   0x2   :  { %v482_v6 = vpack.c.bf16 %v15_v2, %v14_v1  ;;  %v17_v7 = vld [vmem:[%s817_s1 + $0x18] sm:$0xff]  ;;  %v19_v8 = vld [vmem:[%s818_s0] sm:$0x3]  ;;  %v20_v9 = vld [vmem:[%s818_s0 + $0x2] sm:$0x3]  ;;  %v63_v10 = vshrl.u32 %v62_v0, 7 }
   0x3   :  { %v486_v11 = vpack.c.bf16 %v17_v7, %v16_v3  ;;  %v21_v12 = vld [vmem:[%s818_s0 + $0x4] sm:$0x3]  ;;  %v22_v13 = vld [vmem:[%s818_s0 + $0x6] sm:$0x3]  ;;  %v57_v14 = vcombine.low %v19_v8, %v20_v9  ;;  %v61_v15 = vunpack.c.0.s8 %v60_v5  ;;  %v23_v16 = vld [vmem:[%s818_s0 + $0x8] sm:$0x3] }
   0x4   :  { %483 = vmatprep.subr.bf16.mxu0 %v482_v6  ;;  %490 = vmatprep.subr.bf16.mxu1 %v482_v6  ;;  %v58_v17 = vcombine.low %v21_v12, %v22_v13  ;;  %v24_v18 = vld [vmem:[%s818_s0 + $0xa] sm:$0x3]  ;;  %v25_v19 = vld [vmem:[%s818_s0 + $0xc] sm:$0x3]  ;;  %v26_v20 = vld [vmem:[%s818_s0 + $0xe] sm:$0x3] }
   0x5   :  { %485 = vmatpush3.bf16.msra.mxu0 %v482_v6  ;;  %492 = vmatpush3.bf16.msra.mxu1 %v482_v6  ;;  %v586_v21 = vsub.s32 %v61_v15, %v63_v10  ;;  %v74_v22 = vcombine.low %v23_v16, %v24_v18  ;;  %v75_v23 = vcombine.low %v25_v19, %v26_v20  ;;  %v27_v24 = vld [vmem:[%s818_s0 + $0x10] sm:$0x3]  ;;  %v28_v25 = vld [vmem:[%s818_s0 + $0x12] sm:$0x3]  ;;  %v29_v26 = vld [vmem:[%s818_s0 + $0x14] sm:$0x3] }
   0x6   :  { %487 = vmatprep.subr.bf16.mxu0 %v486_v11  ;;  %491 = vmatprep.subr.bf16.mxu1 %v486_v11  ;;  %v30_v27 = vld [vmem:[%s818_s0 + $0x16] sm:$0x3]  ;;  %v91_v28 = vcombine.low %v27_v24, %v28_v25  ;;  %v31_v29 = vld [vmem:[%s818_s0 + $0x18] sm:$0x3]  ;;  %v32_v30 = vld [vmem:[%s818_s0 + $0x1a] sm:$0x3] }
   0x7   :  { %v65_v31 = vrot.slane %v57_v14, %v586_v21  ;;  %v72_v32 = vrot.slane %v58_v17, %v586_v21  ;;  %v82_v33 = vrot.slane %v74_v22, %v586_v21  ;;  %v89_v34 = vrot.slane %v75_v23, %v586_v21  ;;  %v33_v35 = vld [vmem:[%s818_s0 + $0x1c] sm:$0x3]  ;;  %v34_v36 = vld [vmem:[%s818_s0 + $0x1e] sm:$0x3]  ;;  %v455_v48 = vld [vmem:[%s819_s2] ss:$0 sm:$0xff] }
   0x8   :  { %v92_v37 = vcombine.low %v29_v26, %v30_v27  ;;  %v99_v38 = vrot.slane %v91_v28, %v586_v21  ;;  %v108_v39 = vcombine.low %v31_v29, %v32_v30  ;;  %v109_v40 = vcombine.low %v33_v35, %v34_v36 }
   0x9   :  { %489 = vmatpush3.bf16.msra.mxu0 %v486_v11  ;;  %493 = vmatpush3.bf16.msra.mxu1 %v486_v11  ;;  %v73_v41 = vcombine.low %v65_v31, %v72_v32  ;;  %v90_v42 = vcombine.low %v82_v33, %v89_v34 }
   0xa   :  { %v106_v43 = vrot.slane %v92_v37, %v586_v21  ;;  %v116_v44 = vrot.slane %v108_v39, %v586_v21  ;;  %v123_v45 = vrot.slane %v109_v40, %v586_v21 }
   0xb   :  { %476 = vmatprep.mubr.msk.f32.mxu0 %vm125_vm0, %v73_v41 }
   0xc   :  { %477 = vmatmul.mubr.msk.f32.vlgmr.msra.gmra.mrb[0].mxu0 %vm125_vm0, %v90_v42  ;;  %v107_v46 = vcombine.low %v99_v38, %v106_v43  ;;  %v124_v47 = vcombine.low %v116_v44, %v123_v45 }
   0xe   :  { %479 = vmatprep.mubr.msk.f32.mxu1 %vm125_vm0, %v107_v46 }
   0xf   :  { %480 = vmatmul.mubr.msk.f32.vlgmr.msra.gmra.mrb[0].mxu1 %vm125_vm0, %v124_v47 }
  0xdf   :  { %v478_v49 = vpop.f32.mrb[0].mxu0 }
  0xe0   :  { %v206_v50 = vadd.f32 %v478_v49, %v455_v48  ;;  %v200_v51 = vpop.f32.mrb[1].mxu0 }
  0xe1   :  { %v201_v52 = vadd.f32 %v455_v48, %v200_v51 }
  0xe2   :  { %v240_v53 = vcombine.high %v206_v50, %v206_v50  ;;  %v628_v54 = vrot.slane %v206_v50, %v586_v21  ;;  %v481_v55 = vpop.f32.mrb[0].mxu1 }
  0xe3   :  { %v223_v56 = vcombine.high %v201_v52, %v201_v52  ;;  %v631_v57 = vrot.slane %v201_v52, %v586_v21  ;;  %v216_v58 = vadd.f32 %v481_v55, %v455_v48  ;;  %v210_v59 = vpop.f32.mrb[1].mxu1 }
  0xe4   :  { %v634_v60 = vrot.slane %v240_v53, %v586_v21  ;;  %v638_v61 = vcombine.high %v628_v54, %v628_v54  ;;  %v312_v62 = vsel %vm307_vm1, %v628_v54, -inf  ;;  %v211_v63 = vadd.f32 %v455_v48, %v210_v59 }
  0xe5   :  { %v237_v0 = vrot.slane %v223_v56, %v586_v21  ;;  %v238_v1 = vcombine.high %v631_v57, %v631_v57  ;;  %v308_v2 = vsel %vm307_vm1, %v631_v57, -inf  ;;  %v274_v3 = vcombine.high %v216_v58, %v216_v58 }
  0xe6   :  { %v649_v4 = vcombine.high %v634_v60, %v634_v60  ;;  %v314_v5 = vsel %vm307_vm1, %v638_v61, -inf  ;;  %v316_v6 = vsel %vm307_vm1, %v634_v60, -inf  ;;  %v313_v7 = vmax.f32 %v308_v2, %v312_v62 }
  0xe7   :  { %v239_v8 = vcombine.high %v237_v0, %v237_v0  ;;  %v309_v9 = vsel %vm307_vm1, %v238_v1, -inf  ;;  %v310_v10 = vsel %vm307_vm1, %v237_v0, -inf  ;;  %v660_v14 = vrot.slane %v216_v58, %v586_v21 }
  0xe8   :  { %v318_v11 = vsel %vm307_vm1, %v649_v4, -inf  ;;  %v315_v12 = vmax.f32 %v309_v9, %v314_v5  ;;  %v317_v13 = vmax.f32 %v310_v10, %v316_v6  ;;  %v664_v16 = vrot.slane %v274_v3, %v586_v21 }
  0xe9   :  { %v311_v15 = vsel %vm307_vm1, %v239_v8, -inf  ;;  %v257_v17 = vcombine.high %v211_v63, %v211_v63  ;;  %v264_v19 = vrot.slane %v211_v63, %v586_v21  ;;  %v672_v22 = vcombine.high %v660_v14, %v660_v14 }
  0xea   :  { %v319_v18 = vmax.f32 %v311_v15, %v318_v11  ;;  %v677_v25 = vcombine.high %v664_v16, %v664_v16  ;;  %v328_v28 = vsel %vm307_vm1, %v660_v14, -inf  ;;  %v332_v31 = vsel %vm307_vm1, %v664_v16, -inf }
  0xeb   :  { %v668_v20 = vrot.slane %v257_v17, %v586_v21  ;;  %v272_v23 = vcombine.high %v264_v19, %v264_v19  ;;  %v320_v24 = vsel %vm307_vm1, %v264_v19, -inf  ;;  %v330_v35 = vsel %vm307_vm1, %v672_v22, -inf }
  0xec   :  { %v321_v27 = vmax.f32 %v313_v7, %v320_v24  ;;  %v334_v38 = vsel %vm307_vm1, %v677_v25, -inf }
  0xed   :  { %v681_v26 = vcombine.high %v668_v20, %v668_v20  ;;  %v324_v21 = vsel %vm307_vm1, %v668_v20, -inf  ;;  %v322_v29 = vsel %vm307_vm1, %v272_v23, -inf }
  0xee   :  { %v325_v30 = vmax.f32 %v317_v13, %v324_v21  ;;  %v323_v32 = vmax.f32 %v315_v12, %v322_v29  ;;  %v329_v34 = vmax.f32 %v321_v27, %v328_v28 }
  0xef   :  { %v326_v33 = vsel %vm307_vm1, %v681_v26, -inf }
  0xf0   :  { %v327_v36 = vmax.f32 %v319_v18, %v326_v33  ;;  %v333_v37 = vmax.f32 %v325_v30, %v332_v31  ;;  %v331_v39 = vmax.f32 %v323_v32, %v330_v35 }
  0xf2   :  { %v335_v40 = vmax.f32 %v327_v36, %v334_v38  ;;  %v336_v41 = vmax.f32 %v329_v34, %v331_v39 }
  0xf4   :  { %v337_v42 = vmax.f32 %v333_v37, %v335_v40 }
  0xf6   :  { %v696_v43 = vmax.f32 %v336_v41, %v337_v42 }
  0xf8   :  { %v339_v44 = vsub.f32 %v631_v57, %v696_v43  ;;  %v340_v45 = vsub.f32 %v238_v1, %v696_v43  ;;  %v341_v46 = vsub.f32 %v237_v0, %v696_v43  ;;  %v342_v47 = vsub.f32 %v239_v8, %v696_v43 }
  0xf9   :  { %v343_v48 = vsub.f32 %v628_v54, %v696_v43  ;;  %v344_v49 = vsub.f32 %v638_v61, %v696_v43  ;;  %v345_v50 = vsub.f32 %v634_v60, %v696_v43  ;;  %v346_v51 = vsub.f32 %v649_v4, %v696_v43 }
  0xfa   :  { %v347_v52 = vsub.f32 %v264_v19, %v696_v43  ;;  %v348_v53 = vsub.f32 %v272_v23, %v696_v43  ;;  %v349_v55 = vsub.f32 %v668_v20, %v696_v43  ;;  %v350_v56 = vsub.f32 %v681_v26, %v696_v43 }
  0xfb   :  { %v351_v54 = vsub.f32 %v660_v14, %v696_v43  ;;  %v352_v57 = vsub.f32 %v672_v22, %v696_v43  ;;  %v353_v58 = vsub.f32 %v664_v16, %v696_v43  ;;  %v354_v59 = vsub.f32 %v677_v25, %v696_v43 }
  0xfc   :  { %v355_v60 = vmul.f32 1.442695, %v339_v44  ;;  %v357_v61 = vmul.f32 1.442695, %v340_v45  ;;  %v359_v62 = vmul.f32 1.442695, %v341_v46 }
  0xfd   :  { %v361_v63 = vmul.f32 1.442695, %v342_v47  ;;  %v363_v0 = vmul.f32 1.442695, %v343_v48  ;;  %v365_v1 = vmul.f32 1.442695, %v344_v49 }
  0xfe   :  { %495 = vpow2.f32 %v355_v60  ;;  %v367_v2 = vmul.f32 1.442695, %v345_v50  ;;  %v369_v3 = vmul.f32 1.442695, %v346_v51  ;;  %v371_v4 = vmul.f32 1.442695, %v347_v52 }
  0xff   :  { %497 = vpow2.f32 %v357_v61  ;;  %v373_v7 = vmul.f32 1.442695, %v348_v53  ;;  %v375_v12 = vmul.f32 1.442695, %v349_v55  ;;  %v377_v16 = vmul.f32 1.442695, %v350_v56 }
 0x100   :  { %499 = vpow2.f32 %v359_v62  ;;  %v379_v20 = vmul.f32 1.442695, %v351_v54  ;;  %v381_v25 = vmul.f32 1.442695, %v352_v57  ;;  %v383_v28 = vmul.f32 1.442695, %v353_v58 }
 0x101   :  { %501 = vpow2.f32 %v361_v63  ;;  %v385_v32 = vmul.f32 1.442695, %v354_v59 }
 0x102   :  { %503 = vpow2.f32 %v363_v0 }
 0x103   :  { %505 = vpow2.f32 %v365_v1 }
 0x104   :  { %507 = vpow2.f32 %v367_v2 }
 0x105   :  { %509 = vpow2.f32 %v369_v3 }
 0x106   :  { %511 = vpow2.f32 %v371_v4 }
 0x107   :  { %513 = vpow2.f32 %v373_v7 }
 0x108   :  { %v725_v5 = vpop.eup %495  ;;  %515 = vpow2.f32 %v375_v12 }
 0x109   :  { %v727_v6 = vpop.eup %497  ;;  %v387_v8 = vsel %vm307_vm1, %v725_v5, 0.0  ;;  %517 = vpow2.f32 %v377_v16 }
 0x10a   :  { %v731_v9 = vpop.eup %499  ;;  %v388_v10 = vsel %vm307_vm1, %v727_v6, 0.0  ;;  %519 = vpow2.f32 %v379_v20 }
 0x10b   :  { %v502_v11 = vpop.eup %501  ;;  %v389_v13 = vadd.f32 %v388_v10, %v387_v8  ;;  %v390_v14 = vsel %vm307_vm1, %v731_v9, 0.0  ;;  %521 = vpow2.f32 %v381_v25 }
 0x10c   :  { %v504_v15 = vpop.eup %503  ;;  %v392_v18 = vsel %vm307_vm1, %v502_v11, 0.0  ;;  %523 = vpow2.f32 %v383_v28 }
 0x10d   :  { %v391_v17 = vadd.f32 %v390_v14, %v389_v13  ;;  %v506_v19 = vpop.eup %505  ;;  %v394_v23 = vsel %vm307_vm1, %v504_v15, 0.0  ;;  %525 = vpow2.f32 %v385_v32 }
 0x10e   :  { %v508_v24 = vpop.eup %507  ;;  %v396_v27 = vsel %vm307_vm1, %v506_v19, 0.0 }
 0x10f   :  { %v393_v22 = vadd.f32 %v392_v18, %v391_v17  ;;  %v510_v21 = vpop.eup %509  ;;  %v398_v30 = vsel %vm307_vm1, %v508_v24, 0.0 }
 0x110   :  { %v512_v31 = vpop.eup %511  ;;  %v400_v34 = vsel %vm307_vm1, %v510_v21, 0.0 }
 0x111   :  { %v395_v26 = vadd.f32 %v394_v23, %v393_v22  ;;  %v514_v35 = vpop.eup %513  ;;  %v402_v37 = vsel %vm307_vm1, %v512_v31, 0.0 }
 0x112   :  { %v516_v38 = vpop.eup %515  ;;  %v404_v40 = vsel %vm307_vm1, %v514_v35, 0.0 }
 0x113   :  { %v397_v29 = vadd.f32 %v396_v27, %v395_v26  ;;  %v518_v41 = vpop.eup %517  ;;  %v406_v43 = vsel %vm307_vm1, %v516_v38, 0.0 }
 0x114   :  { %v520_v44 = vpop.eup %519  ;;  %v408_v46 = vsel %vm307_vm1, %v518_v41, 0.0 }
 0x115   :  { %v399_v33 = vadd.f32 %v398_v30, %v397_v29  ;;  %v522_v47 = vpop.eup %521  ;;  %v410_v49 = vsel %vm307_vm1, %v520_v44, 0.0 }
 0x116   :  { %v524_v50 = vpop.eup %523  ;;  %v412_v52 = vsel %vm307_vm1, %v522_v47, 0.0 }
 0x117   :  { %v401_v36 = vadd.f32 %v400_v34, %v399_v33  ;;  %v526_v53 = vpop.eup %525  ;;  %v414_v56 = vsel %vm307_vm1, %v524_v50, 0.0 }
 0x118   :  { %v416_v57 = vsel %vm307_vm1, %v526_v53, 0.0 }
 0x119   :  { %v403_v39 = vadd.f32 %v402_v37, %v401_v36 }
 0x11b   :  { %v405_v42 = vadd.f32 %v404_v40, %v403_v39 }
 0x11d   :  { %v407_v45 = vadd.f32 %v406_v43, %v405_v42 }
 0x11f   :  { %v409_v48 = vadd.f32 %v408_v46, %v407_v45 }
 0x121   :  { %v411_v51 = vadd.f32 %v410_v49, %v409_v48 }
 0x123   :  { %v413_v55 = vadd.f32 %v412_v52, %v411_v51 }
 0x125   :  { %v415_v54 = vadd.f32 %v414_v56, %v413_v55 }
 0x127   :  { %v417_v58 = vadd.f32 %v416_v57, %v415_v54 }
 0x129   :  { %527 = vrcp.f32 %v417_v58 }
 0x133   :  { %v528_v59 = vpop.eup %527 }
 0x134   :  { %v419_v60 = vmul.f32 %v528_v59, %v725_v5  ;;  %v420_v61 = vmul.f32 %v528_v59, %v727_v6  ;;  %v421_v62 = vmul.f32 %v528_v59, %v731_v9  ;;  %v422_v63 = vmul.f32 %v528_v59, %v502_v11 }
 0x135   :  { %v423_v0 = vmul.f32 %v528_v59, %v504_v15  ;;  %v424_v1 = vmul.f32 %v528_v59, %v506_v19  ;;  %v425_v2 = vmul.f32 %v528_v59, %v508_v24  ;;  %v426_v3 = vmul.f32 %v528_v59, %v510_v21 }
 0x136   :  { %v427_v4 = vmul.f32 %v528_v59, %v512_v31  ;;  %v428_v7 = vmul.f32 %v528_v59, %v514_v35  ;;  %v429_v8 = vmul.f32 %v528_v59, %v516_v38  ;;  %v430_v10 = vmul.f32 %v528_v59, %v518_v41  ;;  %435 = vst.msk [vmem:[%s820_s3] sm:$0x3] %vm307_vm1, %v419_v60 }
 0x137   :  { %436 = vst.msk [vmem:[%s820_s3 + $0x2] sm:$0x3] %vm307_vm1, %v420_v61  ;;  %437 = vst.msk [vmem:[%s820_s3 + $0x4] sm:$0x3] %vm307_vm1, %v421_v62  ;;  %v431_v5 = vmul.f32 %v528_v59, %v520_v44  ;;  %v432_v6 = vmul.f32 %v528_v59, %v522_v47  ;;  %v433_v9 = vmul.f32 %v528_v59, %v524_v50 }
 0x138   :  { %438 = vst.msk [vmem:[%s820_s3 + $0x6] sm:$0x3] %vm307_vm1, %v422_v63  ;;  %v434_v11 = vmul.f32 %v528_v59, %v526_v53  ;;  %439 = vst.msk [vmem:[%s820_s3 + $0x8] sm:$0x3] %vm307_vm1, %v423_v0 }
 0x139   :  { %440 = vst.msk [vmem:[%s820_s3 + $0xa] sm:$0x3] %vm307_vm1, %v424_v1  ;;  %441 = vst.msk [vmem:[%s820_s3 + $0xc] sm:$0x3] %vm307_vm1, %v425_v2 }
 0x13a   :  { %442 = vst.msk [vmem:[%s820_s3 + $0xe] sm:$0x3] %vm307_vm1, %v426_v3  ;;  %443 = vst.msk [vmem:[%s820_s3 + $0x10] sm:$0x3] %vm307_vm1, %v427_v4 }
 0x13b   :  { %444 = vst.msk [vmem:[%s820_s3 + $0x12] sm:$0x3] %vm307_vm1, %v428_v7  ;;  %445 = vst.msk [vmem:[%s820_s3 + $0x14] sm:$0x3] %vm307_vm1, %v429_v8 }
 0x13c   :  { %446 = vst.msk [vmem:[%s820_s3 + $0x16] sm:$0x3] %vm307_vm1, %v430_v10  ;;  %447 = vst.msk [vmem:[%s820_s3 + $0x18] sm:$0x3] %vm307_vm1, %v431_v5 }
 0x13d   :  { %448 = vst.msk [vmem:[%s820_s3 + $0x1a] sm:$0x3] %vm307_vm1, %v432_v6  ;;  %449 = vst.msk [vmem:[%s820_s3 + $0x1c] sm:$0x3] %vm307_vm1, %v433_v9 }
 0x13e   :  { %450 = vst.msk [vmem:[%s820_s3 + $0x1e] sm:$0x3] %vm307_vm1, %v434_v11 }

// kernel: lstm_classifier_forward.3
= control target key start
LH: loop header
LB: loop body
LE: loop exit
PB: predicated region body
PF: predicated region fallthrough
CT: control target
= control target key end

     0   :  { %s1751_s15 = smov 0   ;;  %s1753_s16 = smov 0   ;;  %s1918_s0 = inlined_call_operand.vmem [shape: f32[16,2,16], index: 0, kind: input, shape index: {}]   ;;  %s1919_s1 = inlined_call_operand.vmem [shape: f32[16,128], index: 1, kind: input, shape index: {}]   ;;  %s1920_s2 = inlined_call_operand.vmem [shape: f32[32,128], index: 2, kind: input, shape index: {}]   ;;  %s1921_s3 = inlined_call_operand.vmem [shape: f32[1,128], index: 3, kind: input, shape index: {}]   ;;  %s1922_s4 = inlined_call_operand.vmem [shape: f32[16,2,32], index: 4, kind: output, shape index: {}]  }
   0x1   :  { %s1755_s17 = smov 0  }
   0x2 LB: > { %s23_s18 = sadd.s32 1, %s1712_s16  ;;  %p1369_p0 = scmp.ge.s32.totalorder %s1716_s17, 1  ;;  %s1716_s17 = sphi %s1755_s17, %s14_s17   ;;  %s1712_s16 = sphi %s1753_s16, %s1924_s16   ;;  %s1708_s15 = sphi %s1751_s15, %s1923_s15  }
   0x3   : > { %p24_p1 = scmp.ge.s32.totalorder %s23_s18, 2  ;;  %p182_p2 = scmp.lt.s32.totalorder %s1716_s17, 3 }
   0x5   : > { %s1926_s18 = smov (%p24_p1, %s23_s18), 0  ;;  %p183_p3 = pnand %p1369_p0, %p182_p2 }
   0x6   : > { %s1370_s19 = sshll.u32 (!%p183_p3), %s1708_s15, 3  ;;  %p1374_p5 = scmp.ne.s32.totalorder (!%p183_p3), %s1708_s15, 0 }
   0x7   : > { %186 = sbr.rel (%p183_p3) target bundleno = 5661 (0x161d), region = 36  ;;  %p215_p4 = scmp.lt.s32.totalorder (!%p183_p3), %s1370_s19, 15 }
   0xe   : > { %s1928_s19 = smov (!%p215_p4, %s1370_s19), 15  ;;  %235 = sbr.rel (%p1374_p5) target bundleno = 21 (0x15), region = 40 }
   0xf   : > { %s1371_s20 = sshll.u32 %s1928_s19, 1  ;;  %vm236_vm0 = vcmask (!%p1374_p5), 254976   ;;  %v1718_v0 = vmov (!%p1374_p5), 0.0  }
  0x10   : > { %s221_s23 = scalar_lea.vmem %s1918_s0, %s1371_s20  ;;  %s1775_s26 = scalar_lea.vmem %s1922_s4, %s1371_s20  ;;  %237 = vst.msk [vmem:[#allocation3] sm:$0x3] (!%p1374_p5), %vm236_vm0, %v1718_v0  ;;  %238 = vst.msk [vmem:[#allocation4] sm:$0x3] (!%p1374_p5), %vm236_vm0, %v1718_v0 }
  0x15 PF: > { %v239_v1 = vld [vmem:[%s1919_s1] sm:$0xff]  ;;  %v240_v2 = vld [vmem:[%s1919_s1 + $0x8] sm:$0xff]  ;;  %v273_v4 = vlaneseq  ;;  %v1719_v9 = vmov 1983009808   ;;  %v1720_v22 = vmov 0.0|0.0   ;;  %v243_v24 = vld [vmem:[%s1920_s2 + $0x10] sm:$0xff] }
  0x16   : > { %v246_v3 = vld [vmem:[%s221_s23] sm:$0x3]  ;;  %v1546_v5 = vpack.c.bf16 %v240_v2, %v239_v1  ;;  %v247_v6 = vld [vmem:[%s221_s23 + $0x2] sm:$0x3]  ;;  %v248_v7 = vld [vmem:[%s221_s23 + $0x4] sm:$0x3]  ;;  %v271_v10 = vunpack.c.l.s4 %v1719_v9  ;;  %1550 = vmatprep.subr.bf16.mxu1 %v1720_v22 }
  0x17   : > { %v249_v8 = vld [vmem:[%s221_s23 + $0x6] sm:$0x3]  ;;  %v268_v11 = vcombine.low %v246_v3, %v247_v6  ;;  %v274_v12 = vshrl.u32 %v273_v4, 7  ;;  %v250_v13 = vld [vmem:[%s221_s23 + $0x8] sm:$0x3]  ;;  %v244_v25 = vld [vmem:[%s1920_s2 + $0x18] sm:$0xff] }
  0x18   : > { %v251_v14 = vld [vmem:[%s221_s23 + $0xa] sm:$0x3]  ;;  %1547 = vmatprep.subr.bf16.mxu0 %v1546_v5  ;;  %v269_v15 = vcombine.low %v248_v7, %v249_v8  ;;  %v272_v16 = vunpack.c.0.s8 %v271_v10  ;;  %v252_v17 = vld [vmem:[%s221_s23 + $0xc] sm:$0x3]  ;;  %v253_v18 = vld [vmem:[%s221_s23 + $0xe] sm:$0x3]  ;;  %v1801_v29 = vpack.c.bf16 %v244_v25, %v243_v24 }
  0x19   : > { %v285_v19 = vcombine.low %v250_v13, %v251_v14  ;;  %v241_v20 = vld [vmem:[%s1920_s2] sm:$0xff]  ;;  %1549 = vmatpush3.bf16.msra.mxu0 %v1546_v5  ;;  %v286_v21 = vcombine.low %v252_v17, %v253_v18  ;;  %v242_v23 = vld [vmem:[%s1920_s2 + $0x8] sm:$0xff]  ;;  %vm1721_vm1 = vmmov 0   ;;  %v1722_v28 = vmov 0.0   ;;  %v434_v36 = vld [vmem:[#allocation3] sm:$0x3] }
  0x1a   : > { %v275_v26 = vsub.s32 %v272_v16, %v274_v12  ;;  %v1796_v27 = vpack.c.bf16 %v242_v23, %v241_v20  ;;  %1466 = vmatprep.mubr.msk.f32.mxu1 %vm1721_vm1, %v1722_v28  ;;  %1556 = vmatprep.subr.bf16.mxu0 %v1720_v22  ;;  %vm302_vm2 = vcmask 130048   ;;  %vm437_vm3 = vcmask 261120   ;;  %v1375_v37 = vld [vmem:[%s1921_s3] ss:$0 sm:$0xff]  ;;  %s1723_s15 = smov 64   ;;  %s1724_s19 = smov 32  }
  0x1b   : > { %v435_v57 = vld [vmem:[#allocation4] sm:$0x3]  ;;  %vm544_vm4 = vcmask 254976   ;;  %s1725_s20 = smov 96  }
  0x1c   : > { %v276_v30 = vrot.slane %v268_v11, %v275_v26  ;;  %v283_v31 = vrot.slane %v269_v15, %v275_v26  ;;  %v293_v32 = vrot.slane %v285_v19, %v275_v26  ;;  %v300_v33 = vrot.slane %v286_v21, %v275_v26  ;;  %1552 = vmatpush3.bf16.msra.mxu1 %v1796_v27 }
  0x1d   : > { %1553 = vmatprep.subr.bf16.mxu1 %v1720_v22 }
  0x1e   : > { %v284_v34 = vcombine.low %v276_v30, %v283_v31  ;;  %v301_v35 = vcombine.low %v293_v32, %v300_v33 }
  0x20   : > { %1455 = vmatprep.mubr.msk.f32.mxu0 %vm302_vm2, %v284_v34  ;;  %1555 = vmatpush3.bf16.msra.mxu1 %v1801_v29 }
  0x21   : > { %1456 = vmatmul.mubr.msk.f32.vlgmr.msra.gmra.mrb[0].mxu0 %vm302_vm2, %v301_v35  ;;  %1562 = vmatprep.subr.bf16.mxu1 %v1720_v22 }
  0x22   : > { %1558 = vmatpush3.bf16.msra.mxu0 %v1796_v27  ;;  %1477 = vmatprep.mubr.msk.f32.mxu0 %vm1721_vm1, %v1722_v28 }
  0x23   : > { %1467 = vmatmul.mubr.msk.f32.vlgmr.msra.gmra.mrb[0].mxu1 %vm437_vm3, %v434_v36  ;;  %1559 = vmatprep.subr.bf16.mxu0 %v1720_v22 }
  0x24   : > { %1564 = vmatpush3.bf16.msra.mxu1 %v1796_v27  ;;  %1488 = vmatprep.mubr.msk.f32.mxu1 %vm1721_vm1, %v1722_v28 }
  0x25   : > { %1565 = vmatprep.subr.bf16.mxu1 %v1720_v22 }
  0x26   : > { %1561 = vmatpush3.bf16.msra.mxu0 %v1801_v29 }
  0x27   : > { %1568 = vmatprep.subr.bf16.mxu0 %v1720_v22 }
  0x28   : > { %1567 = vmatpush3.bf16.msra.mxu1 %v1801_v29 }
  0x29   : > { %1574 = vmatprep.subr.bf16.mxu1 %v1720_v22 }
  0xf4   : > { %v1457_v38 = vpop.f32.mrb[0].mxu0 }
  0xf5   : > { %v379_v39 = vadd.f32 %v1457_v38, %v1375_v37  ;;  %v373_v40 = vpop.f32.mrb[1].mxu0 }
  0xf6   : > { %v374_v41 = vadd.f32 %v1375_v37, %v373_v40  ;;  %v507_v42 = vpop.f32.mrb[0].mxu1 }
  0xf7   : > { %v401_v43 = vcombine.high %v379_v39, %v379_v39  ;;  %v408_v44 = vrot.slane %v379_v39, %v275_v26  ;;  %1380 = vst.sshfl [vmem:[#allocation2 + $0x8] sm:$0x3 pattern:$0x76325410] %v379_v39  ;;  %v1468_v45 = vpop.f32.mrb[1].mxu1 }
  0xf8   : > { %v384_v46 = vcombine.high %v374_v41, %v374_v41  ;;  %v391_v47 = vrot.slane %v374_v41, %v275_v26  ;;  %1378 = vst.sshfl [vmem:[#allocation2] sm:$0x3 pattern:$0x76325410] %v374_v41 }
  0xf9   : > { %v415_v48 = vrot.slane %v401_v43, %v275_v26  ;;  %v416_v49 = vcombine.high %v408_v44, %v408_v44  ;;  %1381 = vst.sshfl [vmem:[#allocation2 + $0xc] sm:$0x3 pattern:$0x76325410] %v401_v43 }
  0xfa   : > { %v398_v50 = vrot.slane %v384_v46, %v275_v26  ;;  %v399_v51 = vcombine.high %v391_v47, %v391_v47  ;;  %1379 = vst.sshfl [vmem:[#allocation2 + $0x4] sm:$0x3 pattern:$0x76325410] %v384_v46 }
  0xfb   : > { %v417_v52 = vcombine.high %v415_v48, %v415_v48  ;;  %431 = vst [vmem:[#allocation2 + $0xa] sm:$0x3] %v416_v49 }
  0xfc   : > { %v400_v53 = vcombine.high %v398_v50, %v398_v50  ;;  %427 = vst [vmem:[#allocation2 + $0x2] sm:$0x3] %v399_v51 }
  0xfd   : > { %433 = vst [vmem:[#allocation2 + $0xe] sm:$0x3] %v417_v52 }
  0xfe   : > { %429 = vst [vmem:[#allocation2 + $0x6] sm:$0x3] %v400_v53 }
  0xff   : > { %v436_v54 = vld [vmem:[#allocation2] sm:$0x3] }
 0x100   : > { %v511_v55 = vadd.f32 %v507_v42, %v436_v54 }
 0x101   : > { %v652_v30 = vld [vmem:[#allocation2 + $0x4] sm:$0x3] }
 0x102   : > { %1630 = vtanh.f32 %v511_v55  ;;  %v1383_v58 = vmul.f32 -1.442695, %v511_v55 }
 0x103   : > { %v547_v8 = vld [vmem:[#allocation2 + $0x2] sm:$0x3] }
 0x104   : > { %1632 = vpow2.f32 %v1383_v58 }
 0x105   : > { %v757_v48 = vld [vmem:[#allocation2 + $0x6] sm:$0x3] }
 0x10c   : > { %v1631_v56 = vpop.eup %1630 }
 0x10d   : > { %525 = vrot.lane.b32.xlu0 %v1631_v56, %s1723_s15 }
 0x10e   : > { %v1633_v59 = vpop.eup %1632 }
 0x10f   : > { %v515_v60 = vadd.f32 1.0, %v1633_v59 }
 0x111   : > { %520 = vrot.lane.b32.xlu0 %v435_v57, %s1724_s19  ;;  %1634 = vrcp.f32 %v515_v60 }
 0x11b   : > { %v1635_v61 = vpop.eup %1634 }
 0x17f   : > { %v526_v62 = vpop.permute.xlu0 %525 }
 0x180   : > { %v528_v63 = vmul.f32 %v1635_v61, %v526_v62 }
 0x182   : > { %530 = vrot.lane.b32.xlu1 %v528_v63, %s1724_s19 }
 0x183   : > { %v521_v0 = vpop.permute.xlu0 %520 }
 0x184   : > { %v523_v1 = vmul.f32 %v1635_v61, %v521_v0 }
 0x1f4   : > { %v531_v2 = vpop.permute.xlu1 %530 }
 0x1f5   : > { %v533_v3 = vadd.f32 %v531_v2, %v523_v1  ;;  %v862_v2 = vld [vmem:[#allocation2 + $0x8] sm:$0x3] }
 0x1f7   : > { %1636 = vtanh.f32 %v533_v3 }
 0x201   : > { %v1637_v4 = vpop.eup %1636 }
 0x202   : > { %536 = vrot.lane.b32.xlu1 %v1637_v4, %s1723_s15 }
 0x274   : > { %v537_v5 = vpop.permute.xlu1 %536 }
 0x275   : > { %v539_v6 = vmul.f32 %v1635_v61, %v537_v5 }
 0x277   : > { %541 = vrot.lane.b32.xlu0 %v539_v6, %s1724_s19 }
 0x2e9   : > { %v542_v7 = vpop.permute.xlu0 %541 }
 0x2ea   : > { %545 = vst.msk [vmem:[%s1775_s26] sm:$0x3] %vm544_vm4, %v542_v7  ;;  %1478 = vmatmul.mubr.msk.f32.vlgmr.msra.gmra.mrb[2].mxu0 %vm437_vm3, %v542_v7 }
 0x2eb   : > { %1570 = vmatpush3.bf16.msra.mxu0 %v1796_v27  ;;  %1499 = vmatprep.mubr.msk.f32.mxu0 %vm1721_vm1, %v1722_v28 }
 0x2ec   : > { %1571 = vmatprep.subr.bf16.mxu0 %v1720_v22 }
 0x2ef   : > { %1573 = vmatpush3.bf16.msra.mxu0 %v1801_v29 }
 0x2f0   : > { %1580 = vmatprep.subr.bf16.mxu0 %v1720_v22 }
 0x3bd   : > { %v616_v9 = vpop.f32.mrb[2].mxu0 }
 0x3be   : > { %v620_v10 = vadd.f32 %v616_v9, %v547_v8  ;;  %v1479_v11 = vpop.f32.mrb[3].mxu0 }
 0x3c0   : > { %1638 = vtanh.f32 %v620_v10  ;;  %v1385_v13 = vmul.f32 -1.442695, %v620_v10 }
 0x3c2   : > { %1640 = vpow2.f32 %v1385_v13 }
 0x3ca   : > { %v1639_v12 = vpop.eup %1638 }
 0x3cb   : > { %630 = vrot.lane.b32.xlu1 %v1639_v12, %s1723_s15 }
 0x3cc   : > { %v1641_v14 = vpop.eup %1640 }
 0x3cd   : > { %v624_v15 = vadd.f32 1.0, %v1641_v14 }
 0x3cf   : > { %1642 = vrcp.f32 %v624_v15 }
 0x3d9   : > { %v1643_v16 = vpop.eup %1642 }
 0x3da   : > { %v628_v19 = vmul.f32 %v1643_v16, %v533_v3 }
 0x43d   : > { %v631_v17 = vpop.permute.xlu1 %630 }
 0x43e   : > { %v633_v18 = vmul.f32 %v1643_v16, %v631_v17 }
 0x440   : > { %635 = vrot.lane.b32.xlu0 %v633_v18, %s1724_s19 }
 0x4b2   : > { %v636_v20 = vpop.permute.xlu0 %635 }
 0x4b3   : > { %v638_v21 = vadd.f32 %v636_v20, %v628_v19  ;;  %v967_v20 = vld [vmem:[#allocation2 + $0xa] sm:$0x3] }
 0x4b5   : > { %1644 = vtanh.f32 %v638_v21 }
 0x4bf   : > { %v1645_v23 = vpop.eup %1644 }
 0x4c0   : > { %641 = vrot.lane.b32.xlu1 %v1645_v23, %s1723_s15 }
 0x532   : > { %v642_v24 = vpop.permute.xlu1 %641 }
 0x533   : > { %v644_v25 = vmul.f32 %v1643_v16, %v642_v24 }
 0x535   : > { %646 = vrot.lane.b32.xlu0 %v644_v25, %s1724_s19 }
 0x5a7   : > { %v647_v26 = vpop.permute.xlu0 %646 }
 0x5a8   : > { %1386 = vst.msk [vmem:[%s1775_s26 + $0x2] sm:$0x3] %vm544_vm4, %v647_v26  ;;  %1489 = vmatmul.mubr.msk.f32.vlgmr.msra.gmra.mrb[2].mxu1 %vm437_vm3, %v647_v26 }
 0x5a9   : > { %1576 = vmatpush3.bf16.msra.mxu1 %v1796_v27  ;;  %1510 = vmatprep.mubr.msk.f32.mxu1 %vm1721_vm1, %v1722_v28 }
 0x5aa   : > { %1577 = vmatprep.subr.bf16.mxu1 %v1720_v22 }
 0x5ad   : > { %1579 = vmatpush3.bf16.msra.mxu1 %v1801_v29 }
 0x5ae   : > { %1586 = vmatprep.subr.bf16.mxu1 %v1720_v22 }
 0x67b   : > { %v721_v31 = vpop.f32.mrb[2].mxu1 }
 0x67c   : > { %v725_v32 = vadd.f32 %v721_v31, %v652_v30  ;;  %v1490_v33 = vpop.f32.mrb[3].mxu1 }
 0x67e   : > { %1646 = vtanh.f32 %v725_v32  ;;  %v1388_v35 = vmul.f32 -1.442695, %v725_v32 }
 0x680   : > { %1648 = vpow2.f32 %v1388_v35 }
 0x688   : > { %v1647_v34 = vpop.eup %1646 }
 0x689   : > { %735 = vrot.lane.b32.xlu1 %v1647_v34, %s1723_s15 }
 0x68a   : > { %v1649_v36 = vpop.eup %1648 }
 0x68b   : > { %v729_v37 = vadd.f32 1.0, %v1649_v36 }
 0x68d   : > { %1650 = vrcp.f32 %v729_v37 }
 0x697   : > { %v1651_v38 = vpop.eup %1650 }
 0x698   : > { %v733_v41 = vmul.f32 %v1651_v38, %v638_v21 }
 0x6fb   : > { %v736_v39 = vpop.permute.xlu1 %735 }
 0x6fc   : > { %v738_v40 = vmul.f32 %v1651_v38, %v736_v39 }
 0x6fe   : > { %740 = vrot.lane.b32.xlu0 %v738_v40, %s1724_s19 }
 0x770   : > { %v741_v42 = vpop.permute.xlu0 %740 }
 0x771   : > { %v743_v43 = vadd.f32 %v741_v42, %v733_v41 }
 0x773   : > { %1652 = vtanh.f32 %v743_v43 }
 0x77d   : > { %v1653_v44 = vpop.eup %1652 }
 0x77e   : > { %746 = vrot.lane.b32.xlu1 %v1653_v44, %s1723_s15 }
 0x7f0   : > { %v747_v45 = vpop.permute.xlu1 %746 }
 0x7f1   : > { %v749_v46 = vmul.f32 %v1651_v38, %v747_v45  ;;  %v1072_v38 = vld [vmem:[#allocation2 + $0xc] sm:$0x3] }
 0x7f3   : > { %751 = vrot.lane.b32.xlu0 %v749_v46, %s1724_s19 }
 0x865   : > { %v752_v47 = vpop.permute.xlu0 %751 }
 0x866   : > { %1389 = vst.msk [vmem:[%s1775_s26 + $0x4] sm:$0x3] %vm544_vm4, %v752_v47  ;;  %1500 = vmatmul.mubr.msk.f32.vlgmr.msra.gmra.mrb[4].mxu0 %vm437_vm3, %v752_v47 }
 0x867   : > { %1582 = vmatpush3.bf16.msra.mxu0 %v1796_v27  ;;  %1521 = vmatprep.mubr.msk.f32.mxu0 %vm1721_vm1, %v1722_v28 }
 0x868   : > { %1583 = vmatprep.subr.bf16.mxu0 %v1720_v22 }
 0x86b   : > { %1585 = vmatpush3.bf16.msra.mxu0 %v1801_v29 }
 0x86c   : > { %1592 = vmatprep.subr.bf16.mxu0 %v1720_v22 }
 0x939   : > { %v826_v49 = vpop.f32.mrb[4].mxu0 }
 0x93a   : > { %v830_v50 = vadd.f32 %v826_v49, %v757_v48  ;;  %v1501_v51 = vpop.f32.mrb[5].mxu0 }
 0x93c   : > { %1654 = vtanh.f32 %v830_v50  ;;  %v1391_v53 = vmul.f32 -1.442695, %v830_v50 }
 0x93e   : > { %1656 = vpow2.f32 %v1391_v53 }
 0x946   : > { %v1655_v52 = vpop.eup %1654 }
 0x947   : > { %840 = vrot.lane.b32.xlu1 %v1655_v52, %s1723_s15 }
 0x948   : > { %v1657_v54 = vpop.eup %1656 }
 0x949   : > { %v834_v55 = vadd.f32 1.0, %v1657_v54 }
 0x94b   : > { %1658 = vrcp.f32 %v834_v55 }
 0x955   : > { %v1659_v56 = vpop.eup %1658 }
 0x956   : > { %v838_v59 = vmul.f32 %v1659_v56, %v743_v43 }
 0x9b9   : > { %v841_v57 = vpop.permute.xlu1 %840 }
 0x9ba   : > { %v843_v58 = vmul.f32 %v1659_v56, %v841_v57 }
 0x9bc   : > { %845 = vrot.lane.b32.xlu0 %v843_v58, %s1724_s19 }
 0xa2e   : > { %v846_v60 = vpop.permute.xlu0 %845 }
 0xa2f   : > { %v848_v61 = vadd.f32 %v846_v60, %v838_v59 }
 0xa31   : > { %1660 = vtanh.f32 %v848_v61 }
 0xa3b   : > { %v1661_v62 = vpop.eup %1660 }
 0xa3c   : > { %851 = vrot.lane.b32.xlu1 %v1661_v62, %s1723_s15 }
 0xaae   : > { %v852_v63 = vpop.permute.xlu1 %851 }
 0xaaf   : > { %v854_v0 = vmul.f32 %v1659_v56, %v852_v63  ;;  %v1177_v56 = vld [vmem:[#allocation2 + $0xe] sm:$0x3] }
 0xab1   : > { %856 = vrot.lane.b32.xlu0 %v854_v0, %s1724_s19 }
 0xb23   : > { %v857_v1 = vpop.permute.xlu0 %856 }
 0xb24   : > { %1392 = vst.msk [vmem:[%s1775_s26 + $0x6] sm:$0x3] %vm544_vm4, %v857_v1  ;;  %1511 = vmatmul.mubr.msk.f32.vlgmr.msra.gmra.mrb[4].mxu1 %vm437_vm3, %v857_v1 }
 0xb25   : > { %1588 = vmatpush3.bf16.msra.mxu1 %v1796_v27  ;;  %1532 = vmatprep.mubr.msk.f32.mxu1 %vm1721_vm1, %v1722_v28 }
 0xb26   : > { %1589 = vmatprep.subr.bf16.mxu1 %v1720_v22 }
 0xb29   : > { %1591 = vmatpush3.bf16.msra.mxu1 %v1801_v29 }
 0xbf7   : > { %v931_v3 = vpop.f32.mrb[4].mxu1 }
 0xbf8   : > { %v935_v4 = vadd.f32 %v931_v3, %v862_v2  ;;  %v1512_v5 = vpop.f32.mrb[5].mxu1 }
 0xbfa   : > { %1662 = vtanh.f32 %v935_v4  ;;  %v1394_v7 = vmul.f32 -1.442695, %v935_v4 }
 0xbfc   : > { %1664 = vpow2.f32 %v1394_v7 }
 0xc04   : > { %v1663_v6 = vpop.eup %1662 }
 0xc05   : > { %945 = vrot.lane.b32.xlu1 %v1663_v6, %s1723_s15 }
 0xc06   : > { %v1665_v8 = vpop.eup %1664 }
 0xc07   : > { %v939_v9 = vadd.f32 1.0, %v1665_v8 }
 0xc09   : > { %1666 = vrcp.f32 %v939_v9 }
 0xc13   : > { %v1667_v10 = vpop.eup %1666 }
 0xc14   : > { %v943_v13 = vmul.f32 %v1667_v10, %v848_v61 }
 0xc77   : > { %v946_v11 = vpop.permute.xlu1 %945 }
 0xc78   : > { %v948_v12 = vmul.f32 %v1667_v10, %v946_v11 }
 0xc7a   : > { %950 = vrot.lane.b32.xlu0 %v948_v12, %s1724_s19 }
 0xcec   : > { %v951_v14 = vpop.permute.xlu0 %950 }
 0xced   : > { %v953_v15 = vadd.f32 %v951_v14, %v943_v13 }
 0xcef   : > { %1668 = vtanh.f32 %v953_v15 }
 0xcf9   : > { %v1669_v16 = vpop.eup %1668 }
 0xcfa   : > { %956 = vrot.lane.b32.xlu1 %v1669_v16, %s1723_s15 }
 0xd6c   : > { %v957_v17 = vpop.permute.xlu1 %956 }
 0xd6d   : > { %v959_v18 = vmul.f32 %v1667_v10, %v957_v17 }
 0xd6f   : > { %961 = vrot.lane.b32.xlu0 %v959_v18, %s1724_s19 }
 0xde1   : > { %v962_v19 = vpop.permute.xlu0 %961 }
 0xde2   : > { %1395 = vst.msk [vmem:[%s1775_s26 + $0x8] sm:$0x3] %vm544_vm4, %v962_v19  ;;  %1522 = vmatmul.mubr.msk.f32.vlgmr.msra.gmra.mrb[6].mxu0 %vm437_vm3, %v962_v19 }
 0xde3   : > { %1594 = vmatpush3.bf16.msra.mxu0 %v1796_v27  ;;  %1543 = vmatprep.mubr.msk.f32.mxu0 %vm1721_vm1, %v1722_v28 }
 0xde4   : > { %1595 = vmatprep.subr.bf16.mxu0 %v1720_v22 }
 0xde7   : > { %1597 = vmatpush3.bf16.msra.mxu0 %v1801_v29 }
 0xeb5   : > { %v1036_v21 = vpop.f32.mrb[6].mxu0 }
 0xeb6   : > { %v1040_v23 = vadd.f32 %v1036_v21, %v967_v20  ;;  %v1523_v24 = vpop.f32.mrb[7].mxu0 }
 0xeb8   : > { %1670 = vtanh.f32 %v1040_v23  ;;  %v1397_v26 = vmul.f32 -1.442695, %v1040_v23 }
 0xeba   : > { %1672 = vpow2.f32 %v1397_v26 }
 0xec2   : > { %v1671_v25 = vpop.eup %1670 }
 0xec3   : > { %1050 = vrot.lane.b32.xlu1 %v1671_v25, %s1723_s15 }
 0xec4   : > { %v1673_v30 = vpop.eup %1672 }
 0xec5   : > { %v1044_v31 = vadd.f32 1.0, %v1673_v30 }
 0xec7   : > { %1674 = vrcp.f32 %v1044_v31 }
 0xed1   : > { %v1675_v27 = vpop.eup %1674 }
 0xed2   : > { %v1048_v22 = vmul.f32 %v1675_v27, %v953_v15 }
 0xf35   : > { %v1051_v28 = vpop.permute.xlu1 %1050 }
 0xf36   : > { %v1053_v32 = vmul.f32 %v1675_v27, %v1051_v28 }
 0xf38   : > { %1055 = vrot.lane.b32.xlu0 %v1053_v32, %s1724_s19 }
 0xfaa   : > { %v1056_v29 = vpop.permute.xlu0 %1055 }
 0xfab   : > { %v1058_v33 = vadd.f32 %v1056_v29, %v1048_v22 }
 0xfad   : > { %1676 = vtanh.f32 %v1058_v33 }
 0xfb7   : > { %v1677_v34 = vpop.eup %1676 }
 0xfb8   : > { %1061 = vrot.lane.b32.xlu1 %v1677_v34, %s1723_s15 }
0x102a   : > { %v1062_v35 = vpop.permute.xlu1 %1061 }
0x102b   : > { %v1064_v36 = vmul.f32 %v1675_v27, %v1062_v35 }
0x102d   : > { %1066 = vrot.lane.b32.xlu0 %v1064_v36, %s1724_s19 }
0x109f   : > { %v1067_v37 = vpop.permute.xlu0 %1066 }
0x10a0   : > { %1398 = vst.msk [vmem:[%s1775_s26 + $0xa] sm:$0x3] %vm544_vm4, %v1067_v37  ;;  %1533 = vmatmul.mubr.msk.f32.vlgmr.msra.gmra.mrb[6].mxu1 %vm437_vm3, %v1067_v37 }
0x1173   : > { %v1141_v39 = vpop.f32.mrb[6].mxu1 }
0x1174   : > { %v1145_v40 = vadd.f32 %v1141_v39, %v1072_v38  ;;  %v1534_v41 = vpop.f32.mrb[7].mxu1 }
0x1176   : > { %1678 = vtanh.f32 %v1145_v40  ;;  %v1400_v43 = vmul.f32 -1.442695, %v1145_v40 }
0x1178   : > { %1680 = vpow2.f32 %v1400_v43 }
0x1180   : > { %v1679_v42 = vpop.eup %1678 }
0x1181   : > { %1155 = vrot.lane.b32.xlu1 %v1679_v42, %s1723_s15 }
0x1182   : > { %v1681_v44 = vpop.eup %1680 }
0x1183   : > { %v1149_v45 = vadd.f32 1.0, %v1681_v44 }
0x1185   : > { %1682 = vrcp.f32 %v1149_v45 }
0x118f   : > { %v1683_v46 = vpop.eup %1682 }
0x1190   : > { %v1153_v49 = vmul.f32 %v1683_v46, %v1058_v33 }
0x11f3   : > { %v1156_v47 = vpop.permute.xlu1 %1155 }
0x11f4   : > { %v1158_v48 = vmul.f32 %v1683_v46, %v1156_v47 }
0x11f6   : > { %1160 = vrot.lane.b32.xlu0 %v1158_v48, %s1724_s19 }
0x1268   : > { %v1161_v50 = vpop.permute.xlu0 %1160 }
0x1269   : > { %v1163_v51 = vadd.f32 %v1161_v50, %v1153_v49 }
0x126b   : > { %1684 = vtanh.f32 %v1163_v51 }
0x1275   : > { %v1685_v52 = vpop.eup %1684 }
0x1276   : > { %1166 = vrot.lane.b32.xlu1 %v1685_v52, %s1723_s15 }
0x12e8   : > { %v1167_v53 = vpop.permute.xlu1 %1166 }
0x12e9   : > { %v1169_v54 = vmul.f32 %v1683_v46, %v1167_v53 }
0x12eb   : > { %1171 = vrot.lane.b32.xlu0 %v1169_v54, %s1724_s19 }
0x135d   : > { %v1172_v55 = vpop.permute.xlu0 %1171 }
0x135e   : > { %1401 = vst.msk [vmem:[%s1775_s26 + $0xc] sm:$0x3] %vm544_vm4, %v1172_v55  ;;  %1544 = vmatmul.mubr.msk.f32.vlgmr.msra.gmra.mrb[8].mxu0 %vm437_vm3, %v1172_v55 }
0x1431   : > { %v1246_v57 = vpop.f32.mrb[8].mxu0 }
0x1432   : > { %v1250_v58 = vadd.f32 %v1246_v57, %v1177_v56  ;;  %v1545_v59 = vpop.f32.mrb[9].mxu0 }
0x1434   : > { %1686 = vtanh.f32 %v1250_v58  ;;  %v1403_v61 = vmul.f32 -1.442695, %v1250_v58 }
0x1436   : > { %1688 = vpow2.f32 %v1403_v61 }
0x143e   : > { %v1687_v60 = vpop.eup %1686 }
0x143f   : > { %1260 = vrot.lane.b32.xlu1 %v1687_v60, %s1723_s15 }
0x1440   : > { %v1689_v62 = vpop.eup %1688 }
0x1441   : > { %v1254_v63 = vadd.f32 1.0, %v1689_v62 }
0x1443   : > { %1690 = vrcp.f32 %v1254_v63 }
0x144d   : > { %v1691_v0 = vpop.eup %1690 }
0x144e   : > { %v1258_v3 = vmul.f32 %v1691_v0, %v1163_v51 }
0x14b1   : > { %v1261_v1 = vpop.permute.xlu1 %1260 }
0x14b2   : > { %v1263_v2 = vmul.f32 %v1691_v0, %v1261_v1 }
0x14b4   : > { %1265 = vrot.lane.b32.xlu0 %v1263_v2, %s1724_s19 }
0x1526   : > { %v1266_v4 = vpop.permute.xlu0 %1265 }
0x1527   : > { %v1268_v5 = vadd.f32 %v1266_v4, %v1258_v3 }
0x1529   : > { %1692 = vtanh.f32 %v1268_v5 }
0x1533   : > { %v1693_v6 = vpop.eup %1692 }
0x1534   : > { %1271 = vrot.lane.b32.xlu1 %v1693_v6, %s1723_s15 }
0x1538   : > { %1283 = vrot.lane.b32.xlu1 %v1268_v5, %s1725_s20 }
0x15a6   : > { %v1272_v7 = vpop.permute.xlu1 %1271 }
0x15a7   : > { %v1274_v8 = vmul.f32 %v1691_v0, %v1272_v7 }
0x15a9   : > { %1276 = vrot.lane.b32.xlu0 %v1274_v8, %s1724_s19 }
0x15aa   : > { %v1284_v9 = vpop.permute.xlu1 %1283 }
0x15ab   : > { %1286 = vst.msk [vmem:[#allocation4] sm:$0x3] %vm544_vm4, %v1284_v9 }
0x161b   : > { %v1277_v10 = vpop.permute.xlu0 %1276 }
0x161c   : > { %1404 = vst.msk [vmem:[%s1775_s26 + $0xe] sm:$0x3] %vm544_vm4, %v1277_v10  ;;  %1281 = vst.msk [vmem:[#allocation3] sm:$0x3] %vm544_vm4, %v1277_v10 }
0x161d PF: > { %s14_s17 = sadd.s32 1, %s1716_s17   ;;  %s1923_s15 = smov %s1712_s16 }
0x161e   : > { %p11_p6 = scmp.ge.s32.totalorder %s14_s17, 4   ;;  %s1924_s16 = smov %s1926_s18 }
0x1620   :  { %13 = sbr.rel (!%p11_p6) target bundleno = 2 (0x2), region = 84 }

// kernel: lstm_classifier_forward.4
= control target key start
LH: loop header
LB: loop body
LE: loop exit
PB: predicated region body
PF: predicated region fallthrough
CT: control target
= control target key end

     0   :  { %s1762_s15 = smov 0   ;;  %s1764_s16 = smov 0   ;;  %s1947_s0 = inlined_call_operand.vmem [shape: f32[16,2,32], index: 0, kind: input, shape index: {}]   ;;  %s1948_s1 = inlined_call_operand.vmem [shape: f32[32,128], index: 1, kind: input, shape index: {}]   ;;  %s1949_s2 = inlined_call_operand.vmem [shape: f32[32,128], index: 2, kind: input, shape index: {}]   ;;  %s1950_s3 = inlined_call_operand.vmem [shape: f32[1,128], index: 3, kind: input, shape index: {}]   ;;  %s1951_s4 = inlined_call_operand.vmem [shape: f32[16,2,32], index: 4, kind: output, shape index: {}]  }
   0x1   :  { %s1766_s17 = smov 0  }
   0x2 LB: > { %s23_s18 = sadd.s32 1, %s1723_s16  ;;  %p1370_p0 = scmp.ge.s32.totalorder %s1727_s17, 1  ;;  %s1727_s17 = sphi %s1766_s17, %s14_s17   ;;  %s1723_s16 = sphi %s1764_s16, %s1953_s16   ;;  %s1719_s15 = sphi %s1762_s15, %s1952_s15  }
   0x3   : > { %p24_p1 = scmp.ge.s32.totalorder %s23_s18, 2  ;;  %p182_p2 = scmp.lt.s32.totalorder %s1727_s17, 3 }
   0x5   : > { %s1955_s18 = smov (%p24_p1, %s23_s18), 0  ;;  %p183_p3 = pnand %p1370_p0, %p182_p2 }
   0x6   : > { %s1371_s19 = sshll.u32 (!%p183_p3), %s1719_s15, 3  ;;  %p1375_p5 = scmp.ne.s32.totalorder (!%p183_p3), %s1719_s15, 0 }
   0x7   : > { %186 = sbr.rel (%p183_p3) target bundleno = 5661 (0x161d), region = 36  ;;  %p215_p4 = scmp.lt.s32.totalorder (!%p183_p3), %s1371_s19, 15 }
   0xe   : > { %s1957_s19 = smov (!%p215_p4, %s1371_s19), 15  ;;  %235 = sbr.rel (%p1375_p5) target bundleno = 21 (0x15), region = 40 }
   0xf   : > { %s1372_s20 = sshll.u32 %s1957_s19, 1  ;;  %vm236_vm0 = vcmask (!%p1375_p5), 254976   ;;  %v1729_v0 = vmov (!%p1375_p5), 0.0  }
  0x10   : > { %s1783_s23 = scalar_lea.vmem %s1947_s0, %s1372_s20  ;;  %s1788_s26 = scalar_lea.vmem %s1951_s4, %s1372_s20  ;;  %237 = vst.msk [vmem:[#allocation3] sm:$0x3] (!%p1375_p5), %vm236_vm0, %v1729_v0  ;;  %238 = vst.msk [vmem:[#allocation4] sm:$0x3] (!%p1375_p5), %vm236_vm0, %v1729_v0 }
  0x15 PF: > { %v239_v1 = vld [vmem:[%s1948_s1] sm:$0xff]  ;;  %v240_v2 = vld [vmem:[%s1948_s1 + $0x8] sm:$0xff]  ;;  %v241_v3 = vld [vmem:[%s1948_s1 + $0x10] sm:$0xff]  ;;  %v275_v4 = vlaneseq  ;;  %v1730_v9 = vmov 1983009808   ;;  %v1731_v15 = vmov 0.0|0.0  }
  0x16   : > { %v1553_v5 = vpack.c.bf16 %v240_v2, %v239_v1  ;;  %v242_v6 = vld [vmem:[%s1948_s1 + $0x18] sm:$0xff]  ;;  %v248_v7 = vld [vmem:[%s1783_s23] sm:$0x3]  ;;  %v249_v8 = vld [vmem:[%s1783_s23 + $0x2] sm:$0x3]  ;;  %v273_v10 = vunpack.c.l.s4 %v1730_v9  ;;  %1561 = vmatprep.subr.bf16.mxu1 %v1731_v15  ;;  %vm1732_vm1 = vmmov 0  }
  0x17   : > { %v1557_v11 = vpack.c.bf16 %v242_v6, %v241_v3  ;;  %v250_v12 = vld [vmem:[%s1783_s23 + $0x4] sm:$0x3]  ;;  %v251_v13 = vld [vmem:[%s1783_s23 + $0x6] sm:$0x3]  ;;  %v276_v14 = vshrl.u32 %v275_v4, 7  ;;  %v270_v17 = vcombine.low %v248_v7, %v249_v8  ;;  %v244_v25 = vld [vmem:[%s1949_s2 + $0x8] sm:$0xff] }
  0x18   : > { %v243_v16 = vld [vmem:[%s1949_s2] sm:$0xff]  ;;  %1554 = vmatprep.subr.bf16.mxu0 %v1553_v5  ;;  %v271_v18 = vcombine.low %v250_v12, %v251_v13  ;;  %v274_v19 = vunpack.c.0.s8 %v273_v10  ;;  %v252_v20 = vld [vmem:[%s1783_s23 + $0x8] sm:$0x3]  ;;  %v253_v21 = vld [vmem:[%s1783_s23 + $0xa] sm:$0x3]  ;;  %v1733_v31 = vmov 0.0  }
  0x19   : > { %v254_v22 = vld [vmem:[%s1783_s23 + $0xc] sm:$0x3]  ;;  %1556 = vmatpush3.bf16.msra.mxu0 %v1553_v5  ;;  %v255_v23 = vld [vmem:[%s1783_s23 + $0xe] sm:$0x3]  ;;  %v287_v24 = vcombine.low %v252_v20, %v253_v21  ;;  %v245_v26 = vld [vmem:[%s1949_s2 + $0x10] sm:$0xff]  ;;  %v1820_v29 = vpack.c.bf16 %v244_v25, %v243_v16  ;;  %1473 = vmatprep.mubr.msk.f32.mxu1 %vm1732_vm1, %v1733_v31  ;;  %vm304_vm2 = vcmask 261120  }
  0x1a   : > { %1558 = vmatprep.subr.bf16.mxu0 %v1557_v11  ;;  %v277_v27 = vsub.s32 %v274_v19, %v276_v14  ;;  %v288_v28 = vcombine.low %v254_v22, %v255_v23  ;;  %v246_v30 = vld [vmem:[%s1949_s2 + $0x18] sm:$0xff]  ;;  %v436_v39 = vld [vmem:[#allocation3] sm:$0x3]  ;;  %v1376_v40 = vld [vmem:[%s1950_s3] ss:$0 sm:$0xff]  ;;  %s1734_s22 = smov 64  }
  0x1b   : > { %v1827_v32 = vpack.c.bf16 %v246_v30, %v245_v26  ;;  %1563 = vmatpush3.bf16.msra.mxu1 %v1820_v29  ;;  %v437_v60 = vld [vmem:[#allocation4] sm:$0x3]  ;;  %s1735_s23 = smov 32   ;;  %vm545_vm3 = vcmask 254976   ;;  %s1736_s24 = smov 96  }
  0x1c   : > { %v278_v33 = vrot.slane %v270_v17, %v277_v27  ;;  %v285_v34 = vrot.slane %v271_v18, %v277_v27  ;;  %v295_v35 = vrot.slane %v287_v24, %v277_v27  ;;  %v302_v36 = vrot.slane %v288_v28, %v277_v27  ;;  %1564 = vmatprep.subr.bf16.mxu1 %v1731_v15 }
  0x1d   : > { %1560 = vmatpush3.bf16.msra.mxu0 %v1557_v11 }
  0x1e   : > { %v286_v37 = vcombine.low %v278_v33, %v285_v34  ;;  %v303_v38 = vcombine.low %v295_v35, %v302_v36  ;;  %1567 = vmatprep.subr.bf16.mxu0 %v1731_v15 }
  0x1f   : > { %1566 = vmatpush3.bf16.msra.mxu1 %v1827_v32 }
  0x20   : > { %1462 = vmatprep.mubr.msk.f32.mxu0 %vm304_vm2, %v286_v37  ;;  %1573 = vmatprep.subr.bf16.mxu1 %v1731_v15 }
  0x21   : > { %1463 = vmatmul.mubr.msk.f32.vlgmr.msra.gmra.mrb[0].mxu0 %vm304_vm2, %v303_v38 }
  0x22   : > { %1569 = vmatpush3.bf16.msra.mxu0 %v1820_v29  ;;  %1484 = vmatprep.mubr.msk.f32.mxu0 %vm1732_vm1, %v1733_v31 }
  0x23   : > { %1474 = vmatmul.mubr.msk.f32.vlgmr.msra.gmra.mrb[0].mxu1 %vm304_vm2, %v436_v39  ;;  %1570 = vmatprep.subr.bf16.mxu0 %v1731_v15 }
  0x24   : > { %1575 = vmatpush3.bf16.msra.mxu1 %v1820_v29  ;;  %1495 = vmatprep.mubr.msk.f32.mxu1 %vm1732_vm1, %v1733_v31 }
  0x25   : > { %1576 = vmatprep.subr.bf16.mxu1 %v1731_v15 }
  0x26   : > { %1572 = vmatpush3.bf16.msra.mxu0 %v1827_v32 }
  0x27   : > { %1579 = vmatprep.subr.bf16.mxu0 %v1731_v15 }
  0x28   : > { %1578 = vmatpush3.bf16.msra.mxu1 %v1827_v32 }
  0x29   : > { %1585 = vmatprep.subr.bf16.mxu1 %v1731_v15 }
  0xf4   : > { %v1464_v41 = vpop.f32.mrb[0].mxu0 }
  0xf5   : > { %v381_v42 = vadd.f32 %v1464_v41, %v1376_v40  ;;  %v375_v43 = vpop.f32.mrb[1].mxu0 }
  0xf6   : > { %v376_v44 = vadd.f32 %v1376_v40, %v375_v43  ;;  %v508_v45 = vpop.f32.mrb[0].mxu1 }
  0xf7   : > { %v403_v46 = vcombine.high %v381_v42, %v381_v42  ;;  %v410_v47 = vrot.slane %v381_v42, %v277_v27  ;;  %1381 = vst.sshfl [vmem:[#allocation2 + $0x8] sm:$0x3 pattern:$0x76325410] %v381_v42  ;;  %v1475_v48 = vpop.f32.mrb[1].mxu1 }
  0xf8   : > { %v386_v49 = vcombine.high %v376_v44, %v376_v44  ;;  %v393_v50 = vrot.slane %v376_v44, %v277_v27  ;;  %1379 = vst.sshfl [vmem:[#allocation2] sm:$0x3 pattern:$0x76325410] %v376_v44 }
  0xf9   : > { %v417_v51 = vrot.slane %v403_v46, %v277_v27  ;;  %v418_v52 = vcombine.high %v410_v47, %v410_v47  ;;  %1382 = vst.sshfl [vmem:[#allocation2 + $0xc] sm:$0x3 pattern:$0x76325410] %v403_v46 }
  0xfa   : > { %v400_v53 = vrot.slane %v386_v49, %v277_v27  ;;  %v401_v54 = vcombine.high %v393_v50, %v393_v50  ;;  %1380 = vst.sshfl [vmem:[#allocation2 + $0x4] sm:$0x3 pattern:$0x76325410] %v386_v49 }
  0xfb   : > { %v419_v55 = vcombine.high %v417_v51, %v417_v51  ;;  %433 = vst [vmem:[#allocation2 + $0xa] sm:$0x3] %v418_v52 }
  0xfc   : > { %v402_v56 = vcombine.high %v400_v53, %v400_v53  ;;  %429 = vst [vmem:[#allocation2 + $0x2] sm:$0x3] %v401_v54 }
  0xfd   : > { %435 = vst [vmem:[#allocation2 + $0xe] sm:$0x3] %v419_v55 }
  0xfe   : > { %431 = vst [vmem:[#allocation2 + $0x6] sm:$0x3] %v402_v56 }
  0xff   : > { %v438_v57 = vld [vmem:[#allocation2] sm:$0x3] }
 0x100   : > { %v512_v58 = vadd.f32 %v508_v45, %v438_v57 }
 0x101   : > { %v653_v33 = vld [vmem:[#allocation2 + $0x4] sm:$0x3] }
 0x102   : > { %1641 = vtanh.f32 %v512_v58  ;;  %v1384_v61 = vmul.f32 -1.442695, %v512_v58 }
 0x103   : > { %v548_v11 = vld [vmem:[#allocation2 + $0x2] sm:$0x3] }
 0x104   : > { %1643 = vpow2.f32 %v1384_v61 }
 0x105   : > { %v758_v51 = vld [vmem:[#allocation2 + $0x6] sm:$0x3] }
 0x10c   : > { %v1642_v59 = vpop.eup %1641 }
 0x10d   : > { %526 = vrot.lane.b32.xlu0 %v1642_v59, %s1734_s22 }
 0x10e   : > { %v1644_v62 = vpop.eup %1643 }
 0x10f   : > { %v516_v63 = vadd.f32 1.0, %v1644_v62 }
 0x111   : > { %521 = vrot.lane.b32.xlu0 %v437_v60, %s1735_s23  ;;  %1645 = vrcp.f32 %v516_v63 }
 0x11b   : > { %v1646_v0 = vpop.eup %1645 }
 0x17f   : > { %v527_v1 = vpop.permute.xlu0 %526 }
 0x180   : > { %v529_v2 = vmul.f32 %v1646_v0, %v527_v1 }
 0x182   : > { %531 = vrot.lane.b32.xlu1 %v529_v2, %s1735_s23 }
 0x183   : > { %v522_v3 = vpop.permute.xlu0 %521 }
 0x184   : > { %v524_v4 = vmul.f32 %v1646_v0, %v522_v3 }
 0x1f4   : > { %v532_v5 = vpop.permute.xlu1 %531 }
 0x1f5   : > { %v534_v6 = vadd.f32 %v532_v5, %v524_v4  ;;  %v863_v5 = vld [vmem:[#allocation2 + $0x8] sm:$0x3] }
 0x1f7   : > { %1647 = vtanh.f32 %v534_v6 }
 0x201   : > { %v1648_v7 = vpop.eup %1647 }
 0x202   : > { %537 = vrot.lane.b32.xlu1 %v1648_v7, %s1734_s22 }
 0x274   : > { %v538_v8 = vpop.permute.xlu1 %537 }
 0x275   : > { %v540_v9 = vmul.f32 %v1646_v0, %v538_v8 }
 0x277   : > { %542 = vrot.lane.b32.xlu0 %v540_v9, %s1735_s23 }
 0x2e9   : > { %v543_v10 = vpop.permute.xlu0 %542 }
 0x2ea   : > { %546 = vst.msk [vmem:[%s1788_s26] sm:$0x3] %vm545_vm3, %v543_v10  ;;  %1485 = vmatmul.mubr.msk.f32.vlgmr.msra.gmra.mrb[2].mxu0 %vm304_vm2, %v543_v10 }
 0x2eb   : > { %1581 = vmatpush3.bf16.msra.mxu0 %v1820_v29  ;;  %1506 = vmatprep.mubr.msk.f32.mxu0 %vm1732_vm1, %v1733_v31 }
 0x2ec   : > { %1582 = vmatprep.subr.bf16.mxu0 %v1731_v15 }
 0x2ef   : > { %1584 = vmatpush3.bf16.msra.mxu0 %v1827_v32 }
 0x2f0   : > { %1591 = vmatprep.subr.bf16.mxu0 %v1731_v15 }
 0x3bd   : > { %v617_v12 = vpop.f32.mrb[2].mxu0 }
 0x3be   : > { %v621_v13 = vadd.f32 %v617_v12, %v548_v11  ;;  %v1486_v14 = vpop.f32.mrb[3].mxu0 }
 0x3c0   : > { %1649 = vtanh.f32 %v621_v13  ;;  %v1386_v17 = vmul.f32 -1.442695, %v621_v13 }
 0x3c2   : > { %1651 = vpow2.f32 %v1386_v17 }
 0x3ca   : > { %v1650_v16 = vpop.eup %1649 }
 0x3cb   : > { %631 = vrot.lane.b32.xlu1 %v1650_v16, %s1734_s22 }
 0x3cc   : > { %v1652_v18 = vpop.eup %1651 }
 0x3cd   : > { %v625_v19 = vadd.f32 1.0, %v1652_v18 }
 0x3cf   : > { %1653 = vrcp.f32 %v625_v19 }
 0x3d9   : > { %v1654_v20 = vpop.eup %1653 }
 0x3da   : > { %v629_v23 = vmul.f32 %v1654_v20, %v534_v6 }
 0x43d   : > { %v632_v21 = vpop.permute.xlu1 %631 }
 0x43e   : > { %v634_v22 = vmul.f32 %v1654_v20, %v632_v21 }
 0x440   : > { %636 = vrot.lane.b32.xlu0 %v634_v22, %s1735_s23 }
 0x4b2   : > { %v637_v24 = vpop.permute.xlu0 %636 }
 0x4b3   : > { %v639_v25 = vadd.f32 %v637_v24, %v629_v23  ;;  %v968_v24 = vld [vmem:[#allocation2 + $0xa] sm:$0x3] }
 0x4b5   : > { %1655 = vtanh.f32 %v639_v25 }
 0x4bf   : > { %v1656_v26 = vpop.eup %1655 }
 0x4c0   : > { %642 = vrot.lane.b32.xlu1 %v1656_v26, %s1734_s22 }
 0x532   : > { %v643_v27 = vpop.permute.xlu1 %642 }
 0x533   : > { %v645_v28 = vmul.f32 %v1654_v20, %v643_v27 }
 0x535   : > { %647 = vrot.lane.b32.xlu0 %v645_v28, %s1735_s23 }
 0x5a7   : > { %v648_v30 = vpop.permute.xlu0 %647 }
 0x5a8   : > { %1387 = vst.msk [vmem:[%s1788_s26 + $0x2] sm:$0x3] %vm545_vm3, %v648_v30  ;;  %1496 = vmatmul.mubr.msk.f32.vlgmr.msra.gmra.mrb[2].mxu1 %vm304_vm2, %v648_v30 }
 0x5a9   : > { %1587 = vmatpush3.bf16.msra.mxu1 %v1820_v29  ;;  %1517 = vmatprep.mubr.msk.f32.mxu1 %vm1732_vm1, %v1733_v31 }
 0x5aa   : > { %1588 = vmatprep.subr.bf16.mxu1 %v1731_v15 }
 0x5ad   : > { %1590 = vmatpush3.bf16.msra.mxu1 %v1827_v32 }
 0x5ae   : > { %1597 = vmatprep.subr.bf16.mxu1 %v1731_v15 }
 0x67b   : > { %v722_v34 = vpop.f32.mrb[2].mxu1 }
 0x67c   : > { %v726_v35 = vadd.f32 %v722_v34, %v653_v33  ;;  %v1497_v36 = vpop.f32.mrb[3].mxu1 }
 0x67e   : > { %1657 = vtanh.f32 %v726_v35  ;;  %v1389_v38 = vmul.f32 -1.442695, %v726_v35 }
 0x680   : > { %1659 = vpow2.f32 %v1389_v38 }
 0x688   : > { %v1658_v37 = vpop.eup %1657 }
 0x689   : > { %736 = vrot.lane.b32.xlu1 %v1658_v37, %s1734_s22 }
 0x68a   : > { %v1660_v39 = vpop.eup %1659 }
 0x68b   : > { %v730_v40 = vadd.f32 1.0, %v1660_v39 }
 0x68d   : > { %1661 = vrcp.f32 %v730_v40 }
 0x697   : > { %v1662_v41 = vpop.eup %1661 }
 0x698   : > { %v734_v44 = vmul.f32 %v1662_v41, %v639_v25 }
 0x6fb   : > { %v737_v42 = vpop.permute.xlu1 %736 }
 0x6fc   : > { %v739_v43 = vmul.f32 %v1662_v41, %v737_v42 }
 0x6fe   : > { %741 = vrot.lane.b32.xlu0 %v739_v43, %s1735_s23 }
 0x770   : > { %v742_v45 = vpop.permute.xlu0 %741 }
 0x771   : > { %v744_v46 = vadd.f32 %v742_v45, %v734_v44 }
 0x773   : > { %1663 = vtanh.f32 %v744_v46 }
 0x77d   : > { %v1664_v47 = vpop.eup %1663 }
 0x77e   : > { %747 = vrot.lane.b32.xlu1 %v1664_v47, %s1734_s22 }
 0x7f0   : > { %v748_v48 = vpop.permute.xlu1 %747 }
 0x7f1   : > { %v750_v49 = vmul.f32 %v1662_v41, %v748_v48  ;;  %v1073_v41 = vld [vmem:[#allocation2 + $0xc] sm:$0x3] }
 0x7f3   : > { %752 = vrot.lane.b32.xlu0 %v750_v49, %s1735_s23 }
 0x865   : > { %v753_v50 = vpop.permute.xlu0 %752 }
 0x866   : > { %1390 = vst.msk [vmem:[%s1788_s26 + $0x4] sm:$0x3] %vm545_vm3, %v753_v50  ;;  %1507 = vmatmul.mubr.msk.f32.vlgmr.msra.gmra.mrb[4].mxu0 %vm304_vm2, %v753_v50 }
 0x867   : > { %1593 = vmatpush3.bf16.msra.mxu0 %v1820_v29  ;;  %1528 = vmatprep.mubr.msk.f32.mxu0 %vm1732_vm1, %v1733_v31 }
 0x868   : > { %1594 = vmatprep.subr.bf16.mxu0 %v1731_v15 }
 0x86b   : > { %1596 = vmatpush3.bf16.msra.mxu0 %v1827_v32 }
 0x86c   : > { %1603 = vmatprep.subr.bf16.mxu0 %v1731_v15 }
 0x939   : > { %v827_v52 = vpop.f32.mrb[4].mxu0 }
 0x93a   : > { %v831_v53 = vadd.f32 %v827_v52, %v758_v51  ;;  %v1508_v54 = vpop.f32.mrb[5].mxu0 }
 0x93c   : > { %1665 = vtanh.f32 %v831_v53  ;;  %v1392_v56 = vmul.f32 -1.442695, %v831_v53 }
 0x93e   : > { %1667 = vpow2.f32 %v1392_v56 }
 0x946   : > { %v1666_v55 = vpop.eup %1665 }
 0x947   : > { %841 = vrot.lane.b32.xlu1 %v1666_v55, %s1734_s22 }
 0x948   : > { %v1668_v57 = vpop.eup %1667 }
 0x949   : > { %v835_v58 = vadd.f32 1.0, %v1668_v57 }
 0x94b   : > { %1669 = vrcp.f32 %v835_v58 }
 0x955   : > { %v1670_v59 = vpop.eup %1669 }
 0x956   : > { %v839_v62 = vmul.f32 %v1670_v59, %v744_v46 }
 0x9b9   : > { %v842_v60 = vpop.permute.xlu1 %841 }
 0x9ba   : > { %v844_v61 = vmul.f32 %v1670_v59, %v842_v60 }
 0x9bc   : > { %846 = vrot.lane.b32.xlu0 %v844_v61, %s1735_s23 }
 0xa2e   : > { %v847_v63 = vpop.permute.xlu0 %846 }
 0xa2f   : > { %v849_v0 = vadd.f32 %v847_v63, %v839_v62 }
 0xa31   : > { %1671 = vtanh.f32 %v849_v0 }
 0xa3b   : > { %v1672_v1 = vpop.eup %1671 }
 0xa3c   : > { %852 = vrot.lane.b32.xlu1 %v1672_v1, %s1734_s22 }
 0xaae   : > { %v853_v2 = vpop.permute.xlu1 %852 }
 0xaaf   : > { %v855_v3 = vmul.f32 %v1670_v59, %v853_v2  ;;  %v1178_v59 = vld [vmem:[#allocation2 + $0xe] sm:$0x3] }
 0xab1   : > { %857 = vrot.lane.b32.xlu0 %v855_v3, %s1735_s23 }
 0xb23   : > { %v858_v4 = vpop.permute.xlu0 %857 }
 0xb24   : > { %1393 = vst.msk [vmem:[%s1788_s26 + $0x6] sm:$0x3] %vm545_vm3, %v858_v4  ;;  %1518 = vmatmul.mubr.msk.f32.vlgmr.msra.gmra.mrb[4].mxu1 %vm304_vm2, %v858_v4 }
 0xb25   : > { %1599 = vmatpush3.bf16.msra.mxu1 %v1820_v29  ;;  %1539 = vmatprep.mubr.msk.f32.mxu1 %vm1732_vm1, %v1733_v31 }
 0xb26   : > { %1600 = vmatprep.subr.bf16.mxu1 %v1731_v15 }
 0xb29   : > { %1602 = vmatpush3.bf16.msra.mxu1 %v1827_v32 }
 0xbf7   : > { %v932_v6 = vpop.f32.mrb[4].mxu1 }
 0xbf8   : > { %v936_v7 = vadd.f32 %v932_v6, %v863_v5  ;;  %v1519_v8 = vpop.f32.mrb[5].mxu1 }
 0xbfa   : > { %1673 = vtanh.f32 %v936_v7  ;;  %v1395_v10 = vmul.f32 -1.442695, %v936_v7 }
 0xbfc   : > { %1675 = vpow2.f32 %v1395_v10 }
 0xc04   : > { %v1674_v9 = vpop.eup %1673 }
 0xc05   : > { %946 = vrot.lane.b32.xlu1 %v1674_v9, %s1734_s22 }
 0xc06   : > { %v1676_v11 = vpop.eup %1675 }
 0xc07   : > { %v940_v12 = vadd.f32 1.0, %v1676_v11 }
 0xc09   : > { %1677 = vrcp.f32 %v940_v12 }
 0xc13   : > { %v1678_v13 = vpop.eup %1677 }
 0xc14   : > { %v944_v17 = vmul.f32 %v1678_v13, %v849_v0 }
 0xc77   : > { %v947_v14 = vpop.permute.xlu1 %946 }
 0xc78   : > { %v949_v16 = vmul.f32 %v1678_v13, %v947_v14 }
 0xc7a   : > { %951 = vrot.lane.b32.xlu0 %v949_v16, %s1735_s23 }
 0xcec   : > { %v952_v18 = vpop.permute.xlu0 %951 }
 0xced   : > { %v954_v19 = vadd.f32 %v952_v18, %v944_v17 }
 0xcef   : > { %1679 = vtanh.f32 %v954_v19 }
 0xcf9   : > { %v1680_v20 = vpop.eup %1679 }
 0xcfa   : > { %957 = vrot.lane.b32.xlu1 %v1680_v20, %s1734_s22 }
 0xd6c   : > { %v958_v21 = vpop.permute.xlu1 %957 }
 0xd6d   : > { %v960_v22 = vmul.f32 %v1678_v13, %v958_v21 }
 0xd6f   : > { %962 = vrot.lane.b32.xlu0 %v960_v22, %s1735_s23 }
 0xde1   : > { %v963_v23 = vpop.permute.xlu0 %962 }
 0xde2   : > { %1396 = vst.msk [vmem:[%s1788_s26 + $0x8] sm:$0x3] %vm545_vm3, %v963_v23  ;;  %1529 = vmatmul.mubr.msk.f32.vlgmr.msra.gmra.mrb[6].mxu0 %vm304_vm2, %v963_v23 }
 0xde3   : > { %1605 = vmatpush3.bf16.msra.mxu0 %v1820_v29  ;;  %1550 = vmatprep.mubr.msk.f32.mxu0 %vm1732_vm1, %v1733_v31 }
 0xde4   : > { %1606 = vmatprep.subr.bf16.mxu0 %v1731_v15 }
 0xde7   : > { %1608 = vmatpush3.bf16.msra.mxu0 %v1827_v32 }
 0xeb5   : > { %v1037_v25 = vpop.f32.mrb[6].mxu0 }
 0xeb6   : > { %v1041_v26 = vadd.f32 %v1037_v25, %v968_v24  ;;  %v1530_v27 = vpop.f32.mrb[7].mxu0 }
 0xeb8   : > { %1681 = vtanh.f32 %v1041_v26  ;;  %v1398_v30 = vmul.f32 -1.442695, %v1041_v26 }
 0xeba   : > { %1683 = vpow2.f32 %v1398_v30 }
 0xec2   : > { %v1682_v28 = vpop.eup %1681 }
 0xec3   : > { %1051 = vrot.lane.b32.xlu1 %v1682_v28, %s1734_s22 }
 0xec4   : > { %v1684_v33 = vpop.eup %1683 }
 0xec5   : > { %v1045_v34 = vadd.f32 1.0, %v1684_v33 }
 0xec7   : > { %1685 = vrcp.f32 %v1045_v34 }
 0xed1   : > { %v1686_v29 = vpop.eup %1685 }
 0xed2   : > { %v1049_v15 = vmul.f32 %v1686_v29, %v954_v19 }
 0xf35   : > { %v1052_v31 = vpop.permute.xlu1 %1051 }
 0xf36   : > { %v1054_v35 = vmul.f32 %v1686_v29, %v1052_v31 }
 0xf38   : > { %1056 = vrot.lane.b32.xlu0 %v1054_v35, %s1735_s23 }
 0xfaa   : > { %v1057_v32 = vpop.permute.xlu0 %1056 }
 0xfab   : > { %v1059_v36 = vadd.f32 %v1057_v32, %v1049_v15 }
 0xfad   : > { %1687 = vtanh.f32 %v1059_v36 }
 0xfb7   : > { %v1688_v37 = vpop.eup %1687 }
 0xfb8   : > { %1062 = vrot.lane.b32.xlu1 %v1688_v37, %s1734_s22 }
0x102a   : > { %v1063_v38 = vpop.permute.xlu1 %1062 }
0x102b   : > { %v1065_v39 = vmul.f32 %v1686_v29, %v1063_v38 }
0x102d   : > { %1067 = vrot.lane.b32.xlu0 %v1065_v39, %s1735_s23 }
0x109f   : > { %v1068_v40 = vpop.permute.xlu0 %1067 }
0x10a0   : > { %1399 = vst.msk [vmem:[%s1788_s26 + $0xa] sm:$0x3] %vm545_vm3, %v1068_v40  ;;  %1540 = vmatmul.mubr.msk.f32.vlgmr.msra.gmra.mrb[6].mxu1 %vm304_vm2, %v1068_v40 }
0x1173   : > { %v1142_v42 = vpop.f32.mrb[6].mxu1 }
0x1174   : > { %v1146_v43 = vadd.f32 %v1142_v42, %v1073_v41  ;;  %v1541_v44 = vpop.f32.mrb[7].mxu1 }
0x1176   : > { %1689 = vtanh.f32 %v1146_v43  ;;  %v1401_v46 = vmul.f32 -1.442695, %v1146_v43 }
0x1178   : > { %1691 = vpow2.f32 %v1401_v46 }
0x1180   : > { %v1690_v45 = vpop.eup %1689 }
0x1181   : > { %1156 = vrot.lane.b32.xlu1 %v1690_v45, %s1734_s22 }
0x1182   : > { %v1692_v47 = vpop.eup %1691 }
0x1183   : > { %v1150_v48 = vadd.f32 1.0, %v1692_v47 }
0x1185   : > { %1693 = vrcp.f32 %v1150_v48 }
0x118f   : > { %v1694_v49 = vpop.eup %1693 }
0x1190   : > { %v1154_v52 = vmul.f32 %v1694_v49, %v1059_v36 }
0x11f3   : > { %v1157_v50 = vpop.permute.xlu1 %1156 }
0x11f4   : > { %v1159_v51 = vmul.f32 %v1694_v49, %v1157_v50 }
0x11f6   : > { %1161 = vrot.lane.b32.xlu0 %v1159_v51, %s1735_s23 }
0x1268   : > { %v1162_v53 = vpop.permute.xlu0 %1161 }
0x1269   : > { %v1164_v54 = vadd.f32 %v1162_v53, %v1154_v52 }
0x126b   : > { %1695 = vtanh.f32 %v1164_v54 }
0x1275   : > { %v1696_v55 = vpop.eup %1695 }
0x1276   : > { %1167 = vrot.lane.b32.xlu1 %v1696_v55, %s1734_s22 }
0x12e8   : > { %v1168_v56 = vpop.permute.xlu1 %1167 }
0x12e9   : > { %v1170_v57 = vmul.f32 %v1694_v49, %v1168_v56 }
0x12eb   : > { %1172 = vrot.lane.b32.xlu0 %v1170_v57, %s1735_s23 }
0x135d   : > { %v1173_v58 = vpop.permute.xlu0 %1172 }
0x135e   : > { %1402 = vst.msk [vmem:[%s1788_s26 + $0xc] sm:$0x3] %vm545_vm3, %v1173_v58  ;;  %1551 = vmatmul.mubr.msk.f32.vlgmr.msra.gmra.mrb[8].mxu0 %vm304_vm2, %v1173_v58 }
0x1431   : > { %v1247_v60 = vpop.f32.mrb[8].mxu0 }
0x1432   : > { %v1251_v61 = vadd.f32 %v1247_v60, %v1178_v59  ;;  %v1552_v62 = vpop.f32.mrb[9].mxu0 }
0x1434   : > { %1697 = vtanh.f32 %v1251_v61  ;;  %v1404_v0 = vmul.f32 -1.442695, %v1251_v61 }
0x1436   : > { %1699 = vpow2.f32 %v1404_v0 }
0x143e   : > { %v1698_v63 = vpop.eup %1697 }
0x143f   : > { %1261 = vrot.lane.b32.xlu1 %v1698_v63, %s1734_s22 }
0x1440   : > { %v1700_v1 = vpop.eup %1699 }
0x1441   : > { %v1255_v2 = vadd.f32 1.0, %v1700_v1 }
0x1443   : > { %1701 = vrcp.f32 %v1255_v2 }
0x144d   : > { %v1702_v3 = vpop.eup %1701 }
0x144e   : > { %v1259_v6 = vmul.f32 %v1702_v3, %v1164_v54 }
0x14b1   : > { %v1262_v4 = vpop.permute.xlu1 %1261 }
0x14b2   : > { %v1264_v5 = vmul.f32 %v1702_v3, %v1262_v4 }
0x14b4   : > { %1266 = vrot.lane.b32.xlu0 %v1264_v5, %s1735_s23 }
0x1526   : > { %v1267_v7 = vpop.permute.xlu0 %1266 }
0x1527   : > { %v1269_v8 = vadd.f32 %v1267_v7, %v1259_v6 }
0x1529   : > { %1703 = vtanh.f32 %v1269_v8 }
0x1533   : > { %v1704_v9 = vpop.eup %1703 }
0x1534   : > { %1272 = vrot.lane.b32.xlu1 %v1704_v9, %s1734_s22 }
0x1538   : > { %1284 = vrot.lane.b32.xlu1 %v1269_v8, %s1736_s24 }
0x15a6   : > { %v1273_v10 = vpop.permute.xlu1 %1272 }
0x15a7   : > { %v1275_v11 = vmul.f32 %v1702_v3, %v1273_v10 }
0x15a9   : > { %1277 = vrot.lane.b32.xlu0 %v1275_v11, %s1735_s23 }
0x15aa   : > { %v1285_v12 = vpop.permute.xlu1 %1284 }
0x15ab   : > { %1287 = vst.msk [vmem:[#allocation4] sm:$0x3] %vm545_vm3, %v1285_v12 }
0x161b   : > { %v1278_v13 = vpop.permute.xlu0 %1277 }
0x161c   : > { %1405 = vst.msk [vmem:[%s1788_s26 + $0xe] sm:$0x3] %vm545_vm3, %v1278_v13  ;;  %1282 = vst.msk [vmem:[#allocation3] sm:$0x3] %vm545_vm3, %v1278_v13 }
0x161d PF: > { %s14_s17 = sadd.s32 1, %s1727_s17   ;;  %s1952_s15 = smov %s1723_s16 }
0x161e   : > { %p11_p6 = scmp.ge.s32.totalorder %s14_s17, 4   ;;  %s1953_s16 = smov %s1955_s18 }
0x1620   :  { %13 = sbr.rel (!%p11_p6) target bundleno = 2 (0x2), region = 84 }

</bundles_post_ra>
